<compile_context>
chip_gen: v6e
topology: v6e:2x2x1
jax: 0.10.0
libtpu: 0.0.40
codegen_flags: <defaults>
</compile_context>

<pallas_src>
import functools

import jax
import jax.numpy as jnp
from jax.experimental import pallas as pl
from jax.experimental.pallas import tpu as pltpu


def _round_up(x, m):
    return (x + m - 1) // m * m


def _conv_kernel(x_ref, w_ref, o_ref, xpad_ref, patch_ref, *,
                 k, stride, pad, H, W, Ho, Wo, Cin, Cout, Cout_pad,
                 rows_per_chunk):
    """One grid step: conv over one batch tile.

    x_ref     : (B, H,  W,  Cin)                   input images (VMEM block)
    w_ref     : (k*k*Cin, Cout_pad)                fused, lane-padded weight
    o_ref     : (B, Ho, Wo, Cout)                  true-Cout output block
    xpad_ref  : (B, Hp, Wp, Cin) scratch           zero-padded activations
    patch_ref : (B, rows_per_chunk, Wo, k*k*Cin)   im2col row-chunk scratch
    """
    B = x_ref.shape[0]
    Hp = H + 2 * pad
    Wp = W + 2 * pad
    kk = k * k

    # ---- "same" zero padding inside VMEM ---------------------------------
    # Only the halo ring is written with zeros; the interior is overwritten
    # every step.  (Re-written each step on purpose: megacore-safe, and the
    # halo is tiny compared to the old full-scratch zero fill.)
    if pad > 0:
        zrows = jnp.zeros((B, pad, Wp, Cin), xpad_ref.dtype)
        xpad_ref[:, 0:pad, :, :] = zrows
        xpad_ref[:, pad + H:Hp, :, :] = zrows
        zcols = jnp.zeros((B, H, pad, Cin), xpad_ref.dtype)
        xpad_ref[:, pad:pad + H, 0:pad, :] = zcols
        xpad_ref[:, pad:pad + H, pad + W:Wp, :] = zcols
        xpad_ref[:, pad:pad + H, pad:pad + W, :] = x_ref[...].astype(xpad_ref.dtype)
        src = xpad_ref
    else:
        src = x_ref                    # pad == 0: no padded copy needed at all

    # Strided (stride > 1) slicing is done on a materialized value for
    # lowering robustness; stride == 1 slices the ref directly (zero cost).
    xfull = src[...] if stride > 1 else None

    n_chunks = (Ho + rows_per_chunk - 1) // rows_per_chunk
    for c in range(n_chunks):                       # static trace-time loop
        r0 = c * rows_per_chunk
        rc = min(rows_per_chunk, Ho - r0)

        # ---- im2col for this chunk of output rows ------------------------
        for ky in range(k):
            for kx in range(k):
                t = ky * k + kx
                if stride == 1:
                    tap = src[:, r0 + ky:r0 + ky + rc, kx:kx + Wo, :]
                else:
                    tap = jax.lax.slice(
                        xfull,
                        (0, ky + r0 * stride, kx, 0),
                        (B, ky + (r0 + rc - 1) * stride + 1,
                         kx + (Wo - 1) * stride + 1, Cin),
                        (1, stride, stride, 1))
                patch_ref[:, :rc, :, t * Cin:(t + 1) * Cin] = tap

        # ---- one fused MXU matmul per row chunk ---------------------------
        patch = patch_ref[:, :rc].reshape(B * rc * Wo, kk * Cin)
        acc = jnp.dot(patch, w_ref[...], preferred_element_type=jnp.float32)

        # Drop the MXU lane padding in-kernel: only true Cout hits HBM.
        out_chunk = acc[:, :Cout].reshape(B, rc, Wo, Cout)
        o_ref[:, r0:r0 + rc, :, :] = out_chunk.astype(o_ref.dtype)


def _vmem_tile_bytes(shape, dtype):
    """Conservative VMEM footprint: last two dims padded to (8, 128) tiling."""
    padded = list(shape)
    if len(padded) >= 2:
        padded[-1] = _round_up(padded[-1], 128)
        padded[-2] = _round_up(padded[-2], 8)
    n = 1
    for d in padded:
        n *= int(d)
    return n * jnp.dtype(dtype).itemsize


def conv2d_pallas_nhwc(x_nhwc, w_hwio, stride=1, *, compute_dtype=None,
                       batch_tile=None):
    """Conv with padding=(k-1)//2, no bias. x: (N,H,W,Cin), w: (k,k,Cin,Cout)."""
    N, H, W, Cin = x_nhwc.shape
    k, k2, Cin_w, Cout = w_hwio.shape
    assert k == k2 and Cin_w == Cin

    pad = (k - 1) // 2
    Ho = (H + 2 * pad - k) // stride + 1
    Wo = (W + 2 * pad - k) // stride + 1
    Hp, Wp = H + 2 * pad, W + 2 * pad
    kk = k * k

    out_dtype = x_nhwc.dtype
    cdt = out_dtype if compute_dtype is None else jnp.dtype(compute_dtype)
    Cout_pad = _round_up(Cout, 128)       # MXU N dim only; never written to HBM

    # Weight: HWIO -> zero-pad O to Cout_pad -> one contiguous (k*k*Cin, Cout_pad).
    w = jnp.pad(w_hwio, ((0, 0), (0, 0), (0, 0), (0, Cout_pad - Cout)))
    w = w.reshape(kk * Cin, Cout_pad).astype(cdt)

    itm = jnp.dtype(cdt).itemsize
    otm = jnp.dtype(out_dtype).itemsize

    def _rows_per_chunk(B):
        # target ~512 rows in the MXU M dimension per dot
        return max(1, min(Ho, max(1, 512 // max(1, B * Wo))))

    def _step_vmem_bytes(B):
        rows = _rows_per_chunk(B)
        return (2 * _vmem_tile_bytes((B, H, W, Cin), cdt)          # in (dbl buf)
                + 2 * _vmem_tile_bytes((B, Ho, Wo, Cout), out_dtype)  # out (dbl buf)
                + 2 * _vmem_tile_bytes((kk * Cin, Cout_pad), cdt)  # weight
                + _vmem_tile_bytes((B, Hp, Wp, Cin), cdt)          # xpad scratch
                + _vmem_tile_bytes((B, rows, Wo, kk * Cin), cdt))  # patch scratch

    # VMEM budget derived from the actual chip (v7x: 64 MiB, v5e/v6e: 128 MiB).
    try:
        vmem_cap = int(pltpu.get_tpu_info().vmem_capacity_bytes)
    except Exception:
        vmem_cap = 128 * 1024 * 1024
    vmem_budget = int(vmem_cap * 0.55)
    vmem_limit = int(min(vmem_cap - (8 << 20), vmem_cap * 3 // 4))
    vmem_limit = max(vmem_limit, 32 * 1024 * 1024)

    if batch_tile is None:
        # Largest divisor of N that fits the budget, capped at N//2 so the
        # "parallel" batch axis produces >= 2 grid steps (v7x has 2 TensorCores).
        max_b = N if N == 1 else max(1, N // 2)
        batch_tile = 1
        for bt in range(max_b, 0, -1):
            if N % bt == 0 and _step_vmem_bytes(bt) <= vmem_budget:
                batch_tile = bt
                break
    assert N % batch_tile == 0
    B = batch_tile
    rows_per_chunk = _rows_per_chunk(B)

    x_in = x_nhwc if x_nhwc.dtype == cdt else x_nhwc.astype(cdt)

    kernel = functools.partial(
        _conv_kernel, k=k, stride=stride, pad=pad, H=H, W=W,
        Ho=Ho, Wo=Wo, Cin=Cin, Cout=Cout, Cout_pad=Cout_pad,
        rows_per_chunk=rows_per_chunk)

    cost = pl.CostEstimate(
        flops=2 * N * Ho * Wo * Cout * kk * Cin,
        transcendentals=0,
        bytes_accessed=(N * H * W * Cin * itm
                        + kk * Cin * Cout_pad * itm
                        + N * Ho * Wo * Cout * otm),
    )

    out = pl.pallas_call(
        kernel,
        out_shape=jax.ShapeDtypeStruct((N, Ho, Wo, Cout), out_dtype),
        grid_spec=pltpu.PrefetchScalarGridSpec(
            num_scalar_prefetch=0,
            grid=(N // B,),
            in_specs=[
                pl.BlockSpec((B, H, W, Cin), lambda n: (n, 0, 0, 0)),
                pl.BlockSpec((kk * Cin, Cout_pad), lambda n: (0, 0)),
            ],
            out_specs=pl.BlockSpec((B, Ho, Wo, Cout), lambda n: (n, 0, 0, 0)),
            scratch_shapes=[
                pltpu.VMEM((B, Hp, Wp, Cin), cdt),                   # padded acts
                pltpu.VMEM((B, rows_per_chunk, Wo, kk * Cin), cdt),  # im2col chunk
            ],
        ),
        compiler_params=pltpu.CompilerParams(
            dimension_semantics=("parallel",),
            vmem_limit_bytes=vmem_limit,
        ),
        cost_estimate=cost,
    )(x_in, w)

    return out    # already (N, Ho, Wo, Cout) with the true Cout — no slice copy


def conv2d_pallas_nchw(x_nchw, w_oihw, stride=1, *, compute_dtype=None):
    """PyTorch-semantics entry point (NCHW input, OIHW weight, bias=False)."""
    x_nhwc = jnp.transpose(x_nchw, (0, 2, 3, 1))    # NCHW -> NHWC (boundary glue)
    w_hwio = jnp.transpose(w_oihw, (2, 3, 1, 0))    # OIHW -> HWIO (boundary glue)
    out_nhwc = conv2d_pallas_nhwc(x_nhwc, w_hwio, stride,
                                  compute_dtype=compute_dtype)
    return jnp.transpose(out_nhwc, (0, 3, 1, 2))    # back to NCHW


if __name__ == "__main__":
    # Small shapes consistent with the module: C(nIn=4, nOut=8, kSize=3, stride=1)
    N, Cin, H, W = 2, 4, 16, 16
    Cout, kSize, stride = 8, 3, 1

    key = jax.random.PRNGKey(0)
    kx_, kw_ = jax.random.split(key)
    x = jax.random.normal(kx_, (N, Cin, H, W), dtype=jnp.float32)                   # NCHW
    w = jax.random.normal(kw_, (Cout, Cin, kSize, kSize), dtype=jnp.float32) * 0.1  # OIHW

    out = conv2d_pallas_nchw(x, w, stride=stride)
    out = jax.block_until_ready(out)

    # Reference check against XLA's conv (same semantics as nn.Conv2d, bias=False).
    pad = (kSize - 1) // 2
    ref = jax.lax.conv_general_dilated(
        x, w,
        window_strides=(stride, stride),
        padding=((pad, pad), (pad, pad)),
        dimension_numbers=("NCHW", "OIHW", "NCHW"),
    )
    assert out.shape == ref.shape, (out.shape, ref.shape)
    assert jnp.allclose(out, ref, atol=1e-4, rtol=1e-4), "mismatch vs reference conv"

    print("KERNEL_OK")
</pallas_src>

<mosaic_0001>
module attributes {stable_mosaic.version = 11 : i64} {
  func.func @_conv_kernel(%arg0: i32, %arg1: memref<1x16x16x4xf32, #tpu.memory_space<vmem>>, %arg2: memref<36x128xf32, #tpu.memory_space<vmem>>, %arg3: memref<1x16x16x8xf32, #tpu.memory_space<vmem>>, %arg4: memref<1x18x18x4xf32, #tpu.memory_space<vmem>>, %arg5: memref<1x16x16x36xf32, #tpu.memory_space<vmem>>) attributes {dimension_semantics = [#tpu.dimension_semantics<parallel>], iteration_bounds = array<i64: 2>, scalar_prefetch = 0 : i64, scratch_operands = 2 : i64, tpu.core_type = #tpu.core_type<tc>, window_params = [{transform_indices = @transform_0, window_bounds = array<i64: 1, 16, 16, 4>}, {pipeline_mode = #tpu.pipeline_mode<synchronous>, transform_indices = @transform_1, window_bounds = array<i64: 36, 128>}, {transform_indices = @transform_2, window_bounds = array<i64: 1, 16, 16, 8>}]} {
    %cst = arith.constant 0.000000e+00 : f32
    %0 = vector.broadcast %cst : f32 to vector<1x1x18x4xf32>
    %c0 = arith.constant 0 : index
    %c0_0 = arith.constant 0 : index
    %c0_1 = arith.constant 0 : index
    %c0_2 = arith.constant 0 : index
    %1 = vector.load %arg4[%c0, %c0_0, %c0_1, %c0_2] : memref<1x18x18x4xf32, #tpu.memory_space<vmem>>, vector<1x1x18x4xf32>
    tpu.vector_store %arg4[%c0, %c0_0, %c0_1, %c0_2], %0 {strides = array<i32>} : memref<1x18x18x4xf32, #tpu.memory_space<vmem>>, vector<1x1x18x4xf32>,
    %c0_3 = arith.constant 0 : index
    %c17 = arith.constant 17 : index
    %c0_4 = arith.constant 0 : index
    %c0_5 = arith.constant 0 : index
    %2 = vector.load %arg4[%c0_3, %c17, %c0_4, %c0_5] : memref<1x18x18x4xf32, #tpu.memory_space<vmem>>, vector<1x1x18x4xf32>
    tpu.vector_store %arg4[%c0_3, %c17, %c0_4, %c0_5], %0 {strides = array<i32>} : memref<1x18x18x4xf32, #tpu.memory_space<vmem>>, vector<1x1x18x4xf32>,
    %cst_6 = arith.constant 0.000000e+00 : f32
    %3 = vector.broadcast %cst_6 : f32 to vector<1x16x1x4xf32>
    %c0_7 = arith.constant 0 : index
    %c1 = arith.constant 1 : index
    %c0_8 = arith.constant 0 : index
    %c0_9 = arith.constant 0 : index
    %4 = vector.load %arg4[%c0_7, %c1, %c0_8, %c0_9] : memref<1x18x18x4xf32, #tpu.memory_space<vmem>>, vector<1x16x1x4xf32>
    tpu.vector_store %arg4[%c0_7, %c1, %c0_8, %c0_9], %3 {strides = array<i32>} : memref<1x18x18x4xf32, #tpu.memory_space<vmem>>, vector<1x16x1x4xf32>,
    %c0_10 = arith.constant 0 : index
    %c1_11 = arith.constant 1 : index
    %c17_12 = arith.constant 17 : index
    %c0_13 = arith.constant 0 : index
    %5 = vector.load %arg4[%c0_10, %c1_11, %c17_12, %c0_13] : memref<1x18x18x4xf32, #tpu.memory_space<vmem>>, vector<1x16x1x4xf32>
    tpu.vector_store %arg4[%c0_10, %c1_11, %c17_12, %c0_13], %3 {strides = array<i32>} : memref<1x18x18x4xf32, #tpu.memory_space<vmem>>, vector<1x16x1x4xf32>,
    %c0_14 = arith.constant 0 : index
    %c0_15 = arith.constant 0 : index
    %c0_16 = arith.constant 0 : index
    %c0_17 = arith.constant 0 : index
    %6 = vector.load %arg1[%c0_14, %c0_15, %c0_16, %c0_17] : memref<1x16x16x4xf32, #tpu.memory_space<vmem>>, vector<1x16x16x4xf32>
    %c0_18 = arith.constant 0 : index
    %c1_19 = arith.constant 1 : index
    %c1_20 = arith.constant 1 : index
    %c0_21 = arith.constant 0 : index
    %7 = vector.load %arg4[%c0_18, %c1_19, %c1_20, %c0_21] : memref<1x18x18x4xf32, #tpu.memory_space<vmem>>, vector<1x16x16x4xf32>
    tpu.vector_store %arg4[%c0_18, %c1_19, %c1_20, %c0_21], %6 {strides = array<i32>} : memref<1x18x18x4xf32, #tpu.memory_space<vmem>>, vector<1x16x16x4xf32>,
    %c0_22 = arith.constant 0 : index
    %c0_23 = arith.constant 0 : index
    %c0_24 = arith.constant 0 : index
    %c0_25 = arith.constant 0 : index
    %8 = vector.load %arg4[%c0_22, %c0_23, %c0_24, %c0_25] : memref<1x18x18x4xf32, #tpu.memory_space<vmem>>, vector<1x16x16x4xf32>
    %c0_26 = arith.constant 0 : index
    %c0_27 = arith.constant 0 : index
    %c0_28 = arith.constant 0 : index
    %c0_29 = arith.constant 0 : index
    %9 = vector.load %arg5[%c0_26, %c0_27, %c0_28, %c0_29] : memref<1x16x16x36xf32, #tpu.memory_space<vmem>>, vector<1x16x16x4xf32>
    tpu.vector_store %arg5[%c0_26, %c0_27, %c0_28, %c0_29], %8 {strides = array<i32>} : memref<1x16x16x36xf32, #tpu.memory_space<vmem>>, vector<1x16x16x4xf32>,
    %c0_30 = arith.constant 0 : index
    %c0_31 = arith.constant 0 : index
    %c1_32 = arith.constant 1 : index
    %c0_33 = arith.constant 0 : index
    %10 = vector.load %arg4[%c0_30, %c0_31, %c1_32, %c0_33] : memref<1x18x18x4xf32, #tpu.memory_space<vmem>>, vector<1x16x16x4xf32>
    %c0_34 = arith.constant 0 : index
    %c0_35 = arith.constant 0 : index
    %c0_36 = arith.constant 0 : index
    %c4 = arith.constant 4 : index
    %11 = vector.load %arg5[%c0_34, %c0_35, %c0_36, %c4] : memref<1x16x16x36xf32, #tpu.memory_space<vmem>>, vector<1x16x16x4xf32>
    tpu.vector_store %arg5[%c0_34, %c0_35, %c0_36, %c4], %10 {strides = array<i32>} : memref<1x16x16x36xf32, #tpu.memory_space<vmem>>, vector<1x16x16x4xf32>,
    %c0_37 = arith.constant 0 : index
    %c0_38 = arith.constant 0 : index
    %c2 = arith.constant 2 : index
    %c0_39 = arith.constant 0 : index
    %12 = vector.load %arg4[%c0_37, %c0_38, %c2, %c0_39] : memref<1x18x18x4xf32, #tpu.memory_space<vmem>>, vector<1x16x16x4xf32>
    %c0_40 = arith.constant 0 : index
    %c0_41 = arith.constant 0 : index
    %c0_42 = arith.constant 0 : index
    %c8 = arith.constant 8 : index
    %13 = vector.load %arg5[%c0_40, %c0_41, %c0_42, %c8] : memref<1x16x16x36xf32, #tpu.memory_space<vmem>>, vector<1x16x16x4xf32>
    tpu.vector_store %arg5[%c0_40, %c0_41, %c0_42, %c8], %12 {strides = array<i32>} : memref<1x16x16x36xf32, #tpu.memory_space<vmem>>, vector<1x16x16x4xf32>,
    %c0_43 = arith.constant 0 : index
    %c1_44 = arith.constant 1 : index
    %c0_45 = arith.constant 0 : index
    %c0_46 = arith.constant 0 : index
    %14 = vector.load %arg4[%c0_43, %c1_44, %c0_45, %c0_46] : memref<1x18x18x4xf32, #tpu.memory_space<vmem>>, vector<1x16x16x4xf32>
    %c0_47 = arith.constant 0 : index
    %c0_48 = arith.constant 0 : index
    %c0_49 = arith.constant 0 : index
    %c12 = arith.constant 12 : index
    %15 = vector.load %arg5[%c0_47, %c0_48, %c0_49, %c12] : memref<1x16x16x36xf32, #tpu.memory_space<vmem>>, vector<1x16x16x4xf32>
    tpu.vector_store %arg5[%c0_47, %c0_48, %c0_49, %c12], %14 {strides = array<i32>} : memref<1x16x16x36xf32, #tpu.memory_space<vmem>>, vector<1x16x16x4xf32>,
    %c0_50 = arith.constant 0 : index
    %c1_51 = arith.constant 1 : index
    %c1_52 = arith.constant 1 : index
    %c0_53 = arith.constant 0 : index
    %16 = vector.load %arg4[%c0_50, %c1_51, %c1_52, %c0_53] : memref<1x18x18x4xf32, #tpu.memory_space<vmem>>, vector<1x16x16x4xf32>
    %c0_54 = arith.constant 0 : index
    %c0_55 = arith.constant 0 : index
    %c0_56 = arith.constant 0 : index
    %c16 = arith.constant 16 : index
    %17 = vector.load %arg5[%c0_54, %c0_55, %c0_56, %c16] : memref<1x16x16x36xf32, #tpu.memory_space<vmem>>, vector<1x16x16x4xf32>
    tpu.vector_store %arg5[%c0_54, %c0_55, %c0_56, %c16], %16 {strides = array<i32>} : memref<1x16x16x36xf32, #tpu.memory_space<vmem>>, vector<1x16x16x4xf32>,
    %c0_57 = arith.constant 0 : index
    %c1_58 = arith.constant 1 : index
    %c2_59 = arith.constant 2 : index
    %c0_60 = arith.constant 0 : index
    %18 = vector.load %arg4[%c0_57, %c1_58, %c2_59, %c0_60] : memref<1x18x18x4xf32, #tpu.memory_space<vmem>>, vector<1x16x16x4xf32>
    %c0_61 = arith.constant 0 : index
    %c0_62 = arith.constant 0 : index
    %c0_63 = arith.constant 0 : index
    %c20 = arith.constant 20 : index
    %19 = vector.load %arg5[%c0_61, %c0_62, %c0_63, %c20] : memref<1x16x16x36xf32, #tpu.memory_space<vmem>>, vector<1x16x16x4xf32>
    tpu.vector_store %arg5[%c0_61, %c0_62, %c0_63, %c20], %18 {strides = array<i32>} : memref<1x16x16x36xf32, #tpu.memory_space<vmem>>, vector<1x16x16x4xf32>,
    %c0_64 = arith.constant 0 : index
    %c2_65 = arith.constant 2 : index
    %c0_66 = arith.constant 0 : index
    %c0_67 = arith.constant 0 : index
    %20 = vector.load %arg4[%c0_64, %c2_65, %c0_66, %c0_67] : memref<1x18x18x4xf32, #tpu.memory_space<vmem>>, vector<1x16x16x4xf32>
    %c0_68 = arith.constant 0 : index
    %c0_69 = arith.constant 0 : index
    %c0_70 = arith.constant 0 : index
    %c24 = arith.constant 24 : index
    %21 = vector.load %arg5[%c0_68, %c0_69, %c0_70, %c24] : memref<1x16x16x36xf32, #tpu.memory_space<vmem>>, vector<1x16x16x4xf32>
    tpu.vector_store %arg5[%c0_68, %c0_69, %c0_70, %c24], %20 {strides = array<i32>} : memref<1x16x16x36xf32, #tpu.memory_space<vmem>>, vector<1x16x16x4xf32>,
    %c0_71 = arith.constant 0 : index
    %c2_72 = arith.constant 2 : index
    %c1_73 = arith.constant 1 : index
    %c0_74 = arith.constant 0 : index
    %22 = vector.load %arg4[%c0_71, %c2_72, %c1_73, %c0_74] : memref<1x18x18x4xf32, #tpu.memory_space<vmem>>, vector<1x16x16x4xf32>
    %c0_75 = arith.constant 0 : index
    %c0_76 = arith.constant 0 : index
    %c0_77 = arith.constant 0 : index
    %c28 = arith.constant 28 : index
    %23 = vector.load %arg5[%c0_75, %c0_76, %c0_77, %c28] : memref<1x16x16x36xf32, #tpu.memory_space<vmem>>, vector<1x16x16x4xf32>
    tpu.vector_store %arg5[%c0_75, %c0_76, %c0_77, %c28], %22 {strides = array<i32>} : memref<1x16x16x36xf32, #tpu.memory_space<vmem>>, vector<1x16x16x4xf32>,
    %c0_78 = arith.constant 0 : index
    %c2_79 = arith.constant 2 : index
    %c2_80 = arith.constant 2 : index
    %c0_81 = arith.constant 0 : index
    %24 = vector.load %arg4[%c0_78, %c2_79, %c2_80, %c0_81] : memref<1x18x18x4xf32, #tpu.memory_space<vmem>>, vector<1x16x16x4xf32>
    %c0_82 = arith.constant 0 : index
    %c0_83 = arith.constant 0 : index
    %c0_84 = arith.constant 0 : index
    %c32 = arith.constant 32 : index
    %25 = vector.load %arg5[%c0_82, %c0_83, %c0_84, %c32] : memref<1x16x16x36xf32, #tpu.memory_space<vmem>>, vector<1x16x16x4xf32>
    tpu.vector_store %arg5[%c0_82, %c0_83, %c0_84, %c32], %24 {strides = array<i32>} : memref<1x16x16x36xf32, #tpu.memory_space<vmem>>, vector<1x16x16x4xf32>,
    %c0_85 = arith.constant 0 : index
    %c0_86 = arith.constant 0 : index
    %c0_87 = arith.constant 0 : index
    %c0_88 = arith.constant 0 : index
    %26 = vector.load %arg5[%c0_85, %c0_86, %c0_87, %c0_88] : memref<1x16x16x36xf32, #tpu.memory_space<vmem>>, vector<1x16x16x36xf32>
    %27 = vector.shape_cast %26 : vector<1x16x16x36xf32> to vector<256x36xf32>
    %c0_89 = arith.constant 0 : index
    %c0_90 = arith.constant 0 : index
    %28 = vector.load %arg2[%c0_89, %c0_90] : memref<36x128xf32, #tpu.memory_space<vmem>>, vector<36x128xf32>
    %cst_91 = arith.constant dense<0.000000e+00> : vector<256x128xf32>
    %29 = tpu.matmul %27, %28, %cst_91 {dimension_numbers = #tpu.dot_dimension_numbers<[1], [0], [0], [1], [0, 0, 1, 1], [], []>} : vector<256x36xf32>, vector<36x128xf32>, vector<256x128xf32> -> vector<256x128xf32>
    %30 = vector.extract_strided_slice %29 {offsets = [0, 0], sizes = [256, 8], strides = [1, 1]} : vector<256x128xf32> to vector<256x8xf32>
    %31 = vector.shape_cast %30 : vector<256x8xf32> to vector<1x16x16x8xf32>
    %c0_92 = arith.constant 0 : index
    %c0_93 = arith.constant 0 : index
    %c0_94 = arith.constant 0 : index
    %c0_95 = arith.constant 0 : index
    %32 = vector.load %arg3[%c0_92, %c0_93, %c0_94, %c0_95] : memref<1x16x16x8xf32, #tpu.memory_space<vmem>>, vector<1x16x16x8xf32>
    tpu.vector_store %arg3[%c0_92, %c0_93, %c0_94, %c0_95], %31 {strides = array<i32>} : memref<1x16x16x8xf32, #tpu.memory_space<vmem>>, vector<1x16x16x8xf32>,
    return
  }
  func.func @transform_0(%arg0: i32) -> (i32, i32, i32, i32) {
    %c0_i32 = arith.constant 0 : i32
    %c0_i32_0 = arith.constant 0 : i32
    %c0_i32_1 = arith.constant 0 : i32
    %c0_i32_2 = arith.constant 0 : i32
    return %arg0, %c0_i32, %c0_i32_0, %c0_i32_1 : i32, i32, i32, i32
  }
  func.func @transform_1(%arg0: i32) -> (i32, i32) {
    %c0_i32 = arith.constant 0 : i32
    %c0_i32_0 = arith.constant 0 : i32
    %c0_i32_1 = arith.constant 0 : i32
    return %c0_i32, %c0_i32_0 : i32, i32
  }
  func.func @transform_2(%arg0: i32) -> (i32, i32, i32, i32) {
    %c0_i32 = arith.constant 0 : i32
    %c0_i32_0 = arith.constant 0 : i32
    %c0_i32_1 = arith.constant 0 : i32
    %c0_i32_2 = arith.constant 0 : i32
    return %arg0, %c0_i32, %c0_i32_0, %c0_i32_1 : i32, i32, i32, i32
  }
}

</mosaic_0001>

<bundles_post_ra>
// kernel: tpu_custom_call.1
= control target key start
LH: loop header
LB: loop body
LE: loop exit
PB: predicated region body
PF: predicated region fallthrough
CT: control target
= control target key end

     0   :  { %s2511_s9 = smov 0   ;;  %s3577_s0 = inlined_call_operand.vmem [shape: f32[2,16,16,4], index: 0, kind: input, shape index: {}]   ;;  %s3578_s1 = inlined_call_operand.vmem [shape: f32[36,128], index: 1, kind: input, shape index: {}]   ;;  %s3579_s2 = inlined_call_operand.vmem [shape: f32[2,16,16,8], index: 2, kind: output, shape index: {}]  }
   0x1 LB: > { %s2311_s10 = sadd.s32 4294967295, %s2485_s9   ;;  %p2315_p0 = scmp.ge.s32.totalorder %s2485_s9, 1  ;;  %s2485_s9 = sphi %s2511_s9, %s12_s9  }
   0x2   : > { %p112_p1 = scmp.lt.s32.totalorder %s2485_s9, 3 }
   0x4   : > { %p113_p2 = pnand %p2315_p0, %p112_p1 }
   0x6   : > { %116 = sbr.rel (%p113_p2) target bundleno = 866 (0x362), region = 28 }
   0xb   : > { %vm144_vm0 = vcmask 31744   ;;  %p2521_p3 = scmp.lt.s32.totalorder %s2311_s10, 1  ;;  %vm147_vm1 = vcmask 25600   ;;  %vm154_vm2 = vcmask 24576   ;;  %v2487_v0 = vmov 0.0   ;;  %s2488_s16 = smov 4  }
   0xc   : > { %145 = vst.msk [vmem:[#allocation2] sm:$0xff] %vm144_vm0, %v2487_v0  ;;  %146 = vst.msk [vmem:[#allocation2 + $0x8] sm:$0xff] %vm144_vm0, %v2487_v0  ;;  %s2489_s17 = smov 8   ;;  %vm475_vm3 = vcmask 64544   ;;  %s2490_s18 = smov 12   ;;  %vm668_vm4 = vcmask 97344  }
   0xd   : > { %150 = vst.msk [vmem:[#allocation2 + $0x198] sm:$0xff] %vm144_vm0, %v2487_v0  ;;  %151 = vst.msk [vmem:[#allocation2 + $0x1a0] sm:$0xff] %vm144_vm0, %v2487_v0  ;;  %s3605_s10 = smov (!%p2521_p3, %s2311_s10), 1  ;;  %s2491_s19 = smov 16   ;;  %vm861_vm5 = vcmask 130144   ;;  %vm1994_vm6 = vcmask 1043456  }
   0xe   : > { %148 = vst.msk [vmem:[#allocation2 + $0x10] sm:$0x3] %vm147_vm1, %v2487_v0  ;;  %152 = vst.msk [vmem:[#allocation2 + $0x1a8] sm:$0x3] %vm147_vm1, %v2487_v0  ;;  %s2355_s12 = sshll.u32 %s3605_s10, 8  ;;  %s2492_s20 = smov 20  }
   0xf   : > { %171 = vst.msk [vmem:[#allocation2 + $0x29] sm:$0x1] %vm154_vm2, %v2487_v0  ;;  %155 = vst.msk [vmem:[#allocation2 + $0x18] sm:$0x1] %vm154_vm2, %v2487_v0  ;;  %s2573_s15 = scalar_lea.vmem %s3577_s0, %s2355_s12  ;;  %s2493_s21 = smov 24   ;;  %vm1054_vm7 = vcmask 162944  }
  0x10   : > { %156 = vst.msk [vmem:[#allocation2 + $0x30] sm:$0x1] %vm154_vm2, %v2487_v0  ;;  %157 = vst.msk [vmem:[#allocation2 + $0x48] sm:$0x1] %vm154_vm2, %v2487_v0  ;;  %v187_v1 = vld [vmem:[%s2573_s15] sm:$0xff]  ;;  %v188_v2 = vld [vmem:[%s2573_s15 + $0x8] sm:$0xff]  ;;  %s3473_s8 = scalar_lea.vmem %s3579_s2, %s2355_s12 }
  0x11   : > { %158 = vst.msk [vmem:[#allocation2 + $0x60] sm:$0x1] %vm154_vm2, %v2487_v0  ;;  %159 = vst.msk [vmem:[#allocation2 + $0x78] sm:$0x1] %vm154_vm2, %v2487_v0  ;;  %v189_v3 = vld [vmem:[%s2573_s15 + $0x10] sm:$0xff]  ;;  %v190_v4 = vld [vmem:[%s2573_s15 + $0x18] sm:$0xff] }
  0x12   : > { %160 = vst.msk [vmem:[#allocation2 + $0x90] sm:$0x1] %vm154_vm2, %v2487_v0  ;;  %161 = vst.msk [vmem:[#allocation2 + $0xa8] sm:$0x1] %vm154_vm2, %v2487_v0  ;;  %v191_v5 = vld [vmem:[%s2573_s15 + $0x20] sm:$0xff]  ;;  %v192_v6 = vld [vmem:[%s2573_s15 + $0x28] sm:$0xff] }
  0x13   : > { %162 = vst.msk [vmem:[#allocation2 + $0xc0] sm:$0x1] %vm154_vm2, %v2487_v0  ;;  %163 = vst.msk [vmem:[#allocation2 + $0xd8] sm:$0x1] %vm154_vm2, %v2487_v0  ;;  %v315_v7 = vld [vmem:[#allocation2 + $0x1] sm:$0xff]  ;;  %v193_v9 = vld [vmem:[%s2573_s15 + $0x30] sm:$0xff] }
  0x14   : > { %164 = vst.msk [vmem:[#allocation2 + $0xf0] sm:$0x1] %vm154_vm2, %v2487_v0  ;;  %165 = vst.msk [vmem:[#allocation2 + $0x108] sm:$0x1] %vm154_vm2, %v2487_v0  ;;  %379 = vrot.lane.b32.xlu0 %v315_v7, %s2488_s16  ;;  %v194_v10 = vld [vmem:[%s2573_s15 + $0x38] sm:$0xff]  ;;  %v195_v11 = vld [vmem:[%s2573_s15 + $0x40] sm:$0xff] }
  0x15   : > { %166 = vst.msk [vmem:[#allocation2 + $0x120] sm:$0x1] %vm154_vm2, %v2487_v0  ;;  %167 = vst.msk [vmem:[#allocation2 + $0x138] sm:$0x1] %vm154_vm2, %v2487_v0  ;;  %v316_v8 = vld [vmem:[#allocation2 + $0x9] sm:$0xff]  ;;  %v198_v14 = vld [vmem:[%s2573_s15 + $0x58] sm:$0xff] }
  0x16   : > { %168 = vst.msk [vmem:[#allocation2 + $0x150] sm:$0x1] %vm154_vm2, %v2487_v0  ;;  %169 = vst.msk [vmem:[#allocation2 + $0x168] sm:$0x1] %vm154_vm2, %v2487_v0  ;;  %v196_v12 = vld [vmem:[%s2573_s15 + $0x48] sm:$0xff]  ;;  %v197_v13 = vld [vmem:[%s2573_s15 + $0x50] sm:$0xff] }
  0x17   : > { %170 = vst.msk [vmem:[#allocation2 + $0x180] sm:$0x1] %vm154_vm2, %v2487_v0  ;;  %172 = vst.msk [vmem:[#allocation2 + $0x41] sm:$0x1] %vm154_vm2, %v2487_v0  ;;  %v199_v15 = vld [vmem:[%s2573_s15 + $0x60] sm:$0xff]  ;;  %v200_v16 = vld [vmem:[%s2573_s15 + $0x68] sm:$0xff] }
  0x18   : > { %173 = vst.msk [vmem:[#allocation2 + $0x59] sm:$0x1] %vm154_vm2, %v2487_v0  ;;  %174 = vst.msk [vmem:[#allocation2 + $0x71] sm:$0x1] %vm154_vm2, %v2487_v0  ;;  %v201_v17 = vld [vmem:[%s2573_s15 + $0x70] sm:$0xff]  ;;  %v202_v18 = vld [vmem:[%s2573_s15 + $0x78] sm:$0xff]  ;;  %381 = vrot.lane.b32.xlu0 %v316_v8, %s2488_s16 }
  0x19   : > { %175 = vst.msk [vmem:[#allocation2 + $0x89] sm:$0x1] %vm154_vm2, %v2487_v0  ;;  %176 = vst.msk [vmem:[#allocation2 + $0xa1] sm:$0x1] %vm154_vm2, %v2487_v0  ;;  %v203_v19 = vld [vmem:[%s2573_s15 + $0x80] sm:$0xff]  ;;  %v204_v20 = vld [vmem:[%s2573_s15 + $0x88] sm:$0xff] }
  0x1a   : > { %177 = vst.msk [vmem:[#allocation2 + $0xb9] sm:$0x1] %vm154_vm2, %v2487_v0  ;;  %178 = vst.msk [vmem:[#allocation2 + $0xd1] sm:$0x1] %vm154_vm2, %v2487_v0  ;;  %v205_v21 = vld [vmem:[%s2573_s15 + $0x90] sm:$0xff]  ;;  %v206_v22 = vld [vmem:[%s2573_s15 + $0x98] sm:$0xff] }
  0x1b   : > { %179 = vst.msk [vmem:[#allocation2 + $0xe9] sm:$0x1] %vm154_vm2, %v2487_v0  ;;  %180 = vst.msk [vmem:[#allocation2 + $0x101] sm:$0x1] %vm154_vm2, %v2487_v0  ;;  %v207_v23 = vld [vmem:[%s2573_s15 + $0xa0] sm:$0xff]  ;;  %v208_v24 = vld [vmem:[%s2573_s15 + $0xa8] sm:$0xff] }
  0x1c   : > { %181 = vst.msk [vmem:[#allocation2 + $0x119] sm:$0x1] %vm154_vm2, %v2487_v0  ;;  %182 = vst.msk [vmem:[#allocation2 + $0x131] sm:$0x1] %vm154_vm2, %v2487_v0  ;;  %v209_v28 = vld [vmem:[%s2573_s15 + $0xb0] sm:$0xff]  ;;  %v210_v29 = vld [vmem:[%s2573_s15 + $0xb8] sm:$0xff] }
  0x1d   : > { %183 = vst.msk [vmem:[#allocation2 + $0x149] sm:$0x1] %vm154_vm2, %v2487_v0  ;;  %184 = vst.msk [vmem:[#allocation2 + $0x161] sm:$0x1] %vm154_vm2, %v2487_v0  ;;  %v211_v33 = vld [vmem:[%s2573_s15 + $0xc0] sm:$0xff]  ;;  %v212_v34 = vld [vmem:[%s2573_s15 + $0xc8] sm:$0xff] }
  0x1e   : > { %185 = vst.msk [vmem:[#allocation2 + $0x179] sm:$0x1] %vm154_vm2, %v2487_v0  ;;  %186 = vst.msk [vmem:[#allocation2 + $0x191] sm:$0x1] %vm154_vm2, %v2487_v0  ;;  %v213_v35 = vld [vmem:[%s2573_s15 + $0xd0] sm:$0xff]  ;;  %v214_v36 = vld [vmem:[%s2573_s15 + $0xd8] sm:$0xff] }
  0x1f   : > { %219 = vst.msk [vmem:[#allocation2 + $0x19] sm:$0xff] %vm144_vm0, %v187_v1  ;;  %220 = vst.msk [vmem:[#allocation2 + $0x21] sm:$0xff] %vm144_vm0, %v188_v2  ;;  %v215_v37 = vld [vmem:[%s2573_s15 + $0xe0] sm:$0xff]  ;;  %v216_v38 = vld [vmem:[%s2573_s15 + $0xe8] sm:$0xff]  ;;  %s2494_s22 = smov 28   ;;  %s2495_s25 = smov 32  }
  0x20   : > { %221 = vst.msk [vmem:[#allocation2 + $0x31] sm:$0xff] %vm144_vm0, %v189_v3  ;;  %222 = vst.msk [vmem:[#allocation2 + $0x39] sm:$0xff] %vm144_vm0, %v190_v4  ;;  %v251_v45 = vld [vmem:[#allocation2] sm:$0xff]  ;;  %v252_v48 = vld [vmem:[#allocation2 + $0x8] sm:$0xff]  ;;  %vm1247_vm8 = vcmask 195744   ;;  %vm1441_vm9 = vcmask 228544  }
  0x21   : > { %223 = vst.msk [vmem:[#allocation2 + $0x49] sm:$0xff] %vm144_vm0, %v191_v5  ;;  %224 = vst.msk [vmem:[#allocation2 + $0x51] sm:$0xff] %vm144_vm0, %v192_v6  ;;  %vm1634_vm10 = vcmask 261344   ;;  %vm1827_vm11 = vcmask 294144   ;;  %vm1897_vm12 = vcmask 293888   ;;  %vm2223_vm13 = vcmask 64512  }
  0x22   : > { %225 = vst.msk [vmem:[#allocation2 + $0x61] sm:$0xff] %vm144_vm0, %v193_v9  ;;  %226 = vst.msk [vmem:[#allocation2 + $0x69] sm:$0xff] %vm144_vm0, %v194_v10 }
  0x23   : > { %227 = vst.msk [vmem:[#allocation2 + $0x79] sm:$0xff] %vm144_vm0, %v195_v11  ;;  %228 = vst.msk [vmem:[#allocation2 + $0x81] sm:$0xff] %vm144_vm0, %v196_v12 }
  0x24   : > { %229 = vst.msk [vmem:[#allocation2 + $0x91] sm:$0xff] %vm144_vm0, %v197_v13  ;;  %230 = vst.msk [vmem:[#allocation2 + $0x99] sm:$0xff] %vm144_vm0, %v198_v14 }
  0x25   : > { %231 = vst.msk [vmem:[#allocation2 + $0xa9] sm:$0xff] %vm144_vm0, %v199_v15  ;;  %232 = vst.msk [vmem:[#allocation2 + $0xb1] sm:$0xff] %vm144_vm0, %v200_v16 }
  0x26   : > { %233 = vst.msk [vmem:[#allocation2 + $0xc1] sm:$0xff] %vm144_vm0, %v201_v17  ;;  %234 = vst.msk [vmem:[#allocation2 + $0xc9] sm:$0xff] %vm144_vm0, %v202_v18  ;;  %v2618_v25 = vld [vmem:[#allocation2 + $0x19] sm:$0xff]  ;;  %v2627_v27 = vld [vmem:[#allocation2 + $0x21] sm:$0xff] }
  0x27   : > { %235 = vst.msk [vmem:[#allocation2 + $0xd9] sm:$0xff] %vm144_vm0, %v203_v19  ;;  %236 = vst.msk [vmem:[#allocation2 + $0xe1] sm:$0xff] %vm144_vm0, %v204_v20  ;;  %v2620_v26 = vld [vmem:[#allocation2 + $0x31] sm:$0xff]  ;;  %383 = vrot.lane.b32.xlu1 %v2618_v25, %s2488_s16  ;;  %v2639_v31 = vld [vmem:[#allocation2 + $0x39] sm:$0xff] }
  0x28   : > { %237 = vst.msk [vmem:[#allocation2 + $0xf1] sm:$0xff] %vm144_vm0, %v205_v21  ;;  %238 = vst.msk [vmem:[#allocation2 + $0xf9] sm:$0xff] %vm144_vm0, %v206_v22  ;;  %387 = vrot.lane.b32.xlu0 %v2620_v26, %s2488_s16  ;;  %v2635_v30 = vld [vmem:[#allocation2 + $0x49] sm:$0xff]  ;;  %v2656_v39 = vld [vmem:[#allocation2 + $0x51] sm:$0xff] }
  0x29   : > { %239 = vst.msk [vmem:[#allocation2 + $0x109] sm:$0xff] %vm144_vm0, %v207_v23  ;;  %240 = vst.msk [vmem:[#allocation2 + $0x111] sm:$0xff] %vm144_vm0, %v208_v24  ;;  %v2643_v32 = vld [vmem:[#allocation2 + $0x61] sm:$0xff]  ;;  %v2667_v41 = vld [vmem:[#allocation2 + $0x69] sm:$0xff] }
  0x2a   : > { %241 = vst.msk [vmem:[#allocation2 + $0x121] sm:$0xff] %vm144_vm0, %v209_v28  ;;  %242 = vst.msk [vmem:[#allocation2 + $0x129] sm:$0xff] %vm144_vm0, %v210_v29  ;;  %v2663_v40 = vld [vmem:[#allocation2 + $0x79] sm:$0xff]  ;;  %v2675_v43 = vld [vmem:[#allocation2 + $0x81] sm:$0xff] }
  0x2b   : > { %385 = vrot.lane.b32.xlu1 %v2627_v27, %s2488_s16  ;;  %243 = vst.msk [vmem:[#allocation2 + $0x139] sm:$0xff] %vm144_vm0, %v211_v33  ;;  %244 = vst.msk [vmem:[#allocation2 + $0x141] sm:$0xff] %vm144_vm0, %v212_v34  ;;  %v2671_v42 = vld [vmem:[#allocation2 + $0x91] sm:$0xff]  ;;  %v2683_v46 = vld [vmem:[#allocation2 + $0x99] sm:$0xff] }
  0x2c   : > { %391 = vrot.lane.b32.xlu0 %v2635_v30, %s2488_s16  ;;  %245 = vst.msk [vmem:[#allocation2 + $0x151] sm:$0xff] %vm144_vm0, %v213_v35  ;;  %246 = vst.msk [vmem:[#allocation2 + $0x159] sm:$0xff] %vm144_vm0, %v214_v36  ;;  %v2679_v44 = vld [vmem:[#allocation2 + $0xa9] sm:$0xff]  ;;  %v2686_v47 = vld [vmem:[#allocation2 + $0x18] sm:$0xff] }
  0x2d   : > { %247 = vst.msk [vmem:[#allocation2 + $0x169] sm:$0xff] %vm144_vm0, %v215_v37  ;;  %248 = vst.msk [vmem:[#allocation2 + $0x171] sm:$0xff] %vm144_vm0, %v216_v38  ;;  %v2693_v49 = vld [vmem:[#allocation2 + $0x20] sm:$0xff]  ;;  %v2695_v50 = vld [vmem:[#allocation2 + $0x30] sm:$0xff] }
  0x2e   : > { %283 = vst.msk [vmem:[#allocation3] sm:$0xff] %vm144_vm0, %v251_v45  ;;  %285 = vst.msk [vmem:[#allocation3 + $0x10] sm:$0xff] %vm144_vm0, %v2686_v47  ;;  %v331_v51 = vld [vmem:[#allocation2 + $0xc1] sm:$0xff]  ;;  %v2701_v52 = vld [vmem:[#allocation2 + $0x38] sm:$0xff] }
  0x2f   : > { %389 = vrot.lane.b32.xlu1 %v2639_v31, %s2488_s16  ;;  %284 = vst.msk [vmem:[#allocation3 + $0x8] sm:$0xff] %vm144_vm0, %v252_v48  ;;  %286 = vst.msk [vmem:[#allocation3 + $0x18] sm:$0xff] %vm144_vm0, %v2693_v49  ;;  %v330_v53 = vld [vmem:[#allocation2 + $0xb1] sm:$0xff]  ;;  %v2707_v54 = vld [vmem:[#allocation2 + $0x48] sm:$0xff] }
  0x30   : > { %395 = vrot.lane.b32.xlu0 %v2643_v32, %s2488_s16  ;;  %287 = vst.msk [vmem:[#allocation3 + $0x20] sm:$0xff] %vm144_vm0, %v2695_v50  ;;  %288 = vst.msk [vmem:[#allocation3 + $0x28] sm:$0xff] %vm144_vm0, %v2701_v52  ;;  %v2709_v55 = vld [vmem:[#allocation2 + $0x50] sm:$0xff]  ;;  %v2711_v56 = vld [vmem:[#allocation2 + $0xd9] sm:$0xff] }
  0x31   : > { %289 = vst.msk [vmem:[#allocation3 + $0x30] sm:$0xff] %vm144_vm0, %v2707_v54  ;;  %290 = vst.msk [vmem:[#allocation3 + $0x38] sm:$0xff] %vm144_vm0, %v2709_v55  ;;  %v2717_v57 = vld [vmem:[#allocation2 + $0x60] sm:$0xff]  ;;  %v2719_v58 = vld [vmem:[#allocation2 + $0x68] sm:$0xff] }
  0x32   : > { %v2721_v59 = vld [vmem:[#allocation2 + $0x78] sm:$0xff]  ;;  %291 = vst.msk [vmem:[#allocation3 + $0x40] sm:$0xff] %vm144_vm0, %v2717_v57  ;;  %292 = vst.msk [vmem:[#allocation3 + $0x48] sm:$0xff] %vm144_vm0, %v2719_v58  ;;  %v2730_v60 = vld [vmem:[#allocation2 + $0x80] sm:$0xff] }
  0x33   : > { %393 = vrot.lane.b32.xlu1 %v2656_v39, %s2488_s16  ;;  %293 = vst.msk [vmem:[#allocation3 + $0x50] sm:$0xff] %vm144_vm0, %v2721_v59  ;;  %v2732_v61 = vld [vmem:[#allocation2 + $0x90] sm:$0xff]  ;;  %v2734_v62 = vld [vmem:[#allocation2 + $0x98] sm:$0xff]  ;;  %294 = vst.msk [vmem:[#allocation3 + $0x58] sm:$0xff] %vm144_vm0, %v2730_v60 }
  0x34   : > { %399 = vrot.lane.b32.xlu0 %v2663_v40, %s2488_s16  ;;  %v332_v63 = vld [vmem:[#allocation2 + $0xc9] sm:$0xff]  ;;  %295 = vst.msk [vmem:[#allocation3 + $0x60] sm:$0xff] %vm144_vm0, %v2732_v61  ;;  %296 = vst.msk [vmem:[#allocation3 + $0x68] sm:$0xff] %vm144_vm0, %v2734_v62  ;;  %v2746_v2 = vld [vmem:[#allocation2 + $0xc0] sm:$0xff] }
  0x35   : > { %v2742_v0 = vld [vmem:[#allocation2 + $0xa8] sm:$0xff]  ;;  %v2744_v1 = vld [vmem:[#allocation2 + $0xb0] sm:$0xff]  ;;  %299 = vst.msk [vmem:[#allocation3 + $0x80] sm:$0xff] %vm144_vm0, %v2746_v2  ;;  %v2757_v4 = vld [vmem:[#allocation2 + $0xd8] sm:$0xff] }
  0x36   : > { %297 = vst.msk [vmem:[#allocation3 + $0x70] sm:$0xff] %vm144_vm0, %v2742_v0  ;;  %298 = vst.msk [vmem:[#allocation3 + $0x78] sm:$0xff] %vm144_vm0, %v2744_v1  ;;  %v2755_v3 = vld [vmem:[#allocation2 + $0xc8] sm:$0xff]  ;;  %v2759_v5 = vld [vmem:[#allocation2 + $0xe0] sm:$0xff] }
  0x37   : > { %397 = vrot.lane.b32.xlu1 %v2667_v41, %s2488_s16  ;;  %300 = vst.msk [vmem:[#allocation3 + $0x88] sm:$0xff] %vm144_vm0, %v2755_v3  ;;  %301 = vst.msk [vmem:[#allocation3 + $0x90] sm:$0xff] %vm144_vm0, %v2757_v4  ;;  %v2767_v6 = vld [vmem:[#allocation2 + $0xf0] sm:$0xff]  ;;  %v2769_v7 = vld [vmem:[#allocation2 + $0xf8] sm:$0xff] }
  0x38   : > { %403 = vrot.lane.b32.xlu0 %v2671_v42, %s2488_s16  ;;  %302 = vst.msk [vmem:[#allocation3 + $0x98] sm:$0xff] %vm144_vm0, %v2759_v5  ;;  %v2771_v8 = vld [vmem:[#allocation2 + $0x108] sm:$0xff]  ;;  %303 = vst.msk [vmem:[#allocation3 + $0xa0] sm:$0xff] %vm144_vm0, %v2767_v6  ;;  %v2781_v9 = vld [vmem:[#allocation2 + $0x110] sm:$0xff] }
  0x39   : > { %304 = vst.msk [vmem:[#allocation3 + $0xa8] sm:$0xff] %vm144_vm0, %v2769_v7  ;;  %305 = vst.msk [vmem:[#allocation3 + $0xb0] sm:$0xff] %vm144_vm0, %v2771_v8  ;;  %v2783_v10 = vld [vmem:[#allocation2 + $0xf1] sm:$0xff]  ;;  %v2787_v11 = vld [vmem:[#allocation2 + $0x120] sm:$0xff] }
  0x3a   : > { %306 = vst.msk [vmem:[#allocation3 + $0xb8] sm:$0xff] %vm144_vm0, %v2781_v9  ;;  %307 = vst.msk [vmem:[#allocation3 + $0xc0] sm:$0xff] %vm144_vm0, %v2787_v11  ;;  %v2792_v12 = vld [vmem:[#allocation2 + $0x128] sm:$0xff]  ;;  %v2800_v15 = vld [vmem:[#allocation2 + $0x138] sm:$0xff] }
  0x3b   : > { %401 = vrot.lane.b32.xlu1 %v2675_v43, %s2488_s16  ;;  %v2794_v13 = vld [vmem:[#allocation2 + $0xe1] sm:$0xff]  ;;  %308 = vst.msk [vmem:[#allocation3 + $0xc8] sm:$0xff] %vm144_vm0, %v2792_v12  ;;  %v337_v14 = vld [vmem:[#allocation2 + $0x109] sm:$0xff]  ;;  %309 = vst.msk [vmem:[#allocation3 + $0xd0] sm:$0xff] %vm144_vm0, %v2800_v15 }
  0x3c   : > { %407 = vrot.lane.b32.xlu0 %v2679_v44, %s2488_s16  ;;  %v2806_v16 = vld [vmem:[#allocation2 + $0x140] sm:$0xff]  ;;  %v2813_v19 = vld [vmem:[#allocation2 + $0x150] sm:$0xff]  ;;  %v2819_v20 = vld [vmem:[#allocation2 + $0x158] sm:$0xff] }
  0x3d   : > { %v2808_v17 = vld [vmem:[#allocation2 + $0xf9] sm:$0xff]  ;;  %310 = vst.msk [vmem:[#allocation3 + $0xd8] sm:$0xff] %vm144_vm0, %v2806_v16  ;;  %v339_v18 = vld [vmem:[#allocation2 + $0x121] sm:$0xff]  ;;  %311 = vst.msk [vmem:[#allocation3 + $0xe0] sm:$0xff] %vm144_vm0, %v2813_v19 }
  0x3e   : > { %v338_v21 = vld [vmem:[#allocation2 + $0x111] sm:$0xff]  ;;  %312 = vst.msk [vmem:[#allocation3 + $0xe8] sm:$0xff] %vm144_vm0, %v2819_v20  ;;  %v341_v22 = vld [vmem:[#allocation2 + $0x139] sm:$0xff]  ;;  %v2824_v23 = vld [vmem:[#allocation2 + $0x168] sm:$0xff] }
  0x3f   : > { %405 = vrot.lane.b32.xlu1 %v2683_v46, %s2488_s16  ;;  %313 = vst.msk [vmem:[#allocation3 + $0xf0] sm:$0xff] %vm144_vm0, %v2824_v23  ;;  %v2829_v24 = vld [vmem:[#allocation2 + $0x170] sm:$0xff]  ;;  %v342_v33 = vld [vmem:[#allocation2 + $0x141] sm:$0xff]  ;;  %v218_v36 = vld [vmem:[%s2573_s15 + $0xf8] sm:$0xff] }
  0x40   : > { %411 = vrot.lane.b32.xlu0 %v331_v51, %s2488_s16  ;;  %v340_v28 = vld [vmem:[#allocation2 + $0x129] sm:$0xff]  ;;  %314 = vst.msk [vmem:[#allocation3 + $0xf8] sm:$0xff] %vm144_vm0, %v2829_v24  ;;  %v343_v29 = vld [vmem:[#allocation2 + $0x151] sm:$0xff]  ;;  %250 = vst.msk [vmem:[#allocation2 + $0x189] sm:$0xff] %vm144_vm0, %v218_v36 }
  0x41   : > { %v217_v34 = vld [vmem:[%s2573_s15 + $0xf0] sm:$0xff]  ;;  %v344_v37 = vld [vmem:[#allocation2 + $0x159] sm:$0xff]  ;;  %v508_v38 = vld [vmem:[#allocation2 + $0x2] sm:$0xff] }
  0x42   : > { %249 = vst.msk [vmem:[#allocation2 + $0x181] sm:$0xff] %vm144_vm0, %v217_v34  ;;  %v345_v35 = vld [vmem:[#allocation2 + $0x169] sm:$0xff]  ;;  %v346_v45 = vld [vmem:[#allocation2 + $0x171] sm:$0xff]  ;;  %v2844_v48 = vld [vmem:[#allocation2 + $0x1a] sm:$0xff] }
  0x43   : > { %409 = vrot.lane.b32.xlu1 %v330_v53, %s2488_s16  ;;  %v509_v51 = vld [vmem:[#allocation2 + $0xa] sm:$0xff]  ;;  %v2849_v53 = vld [vmem:[#allocation2 + $0x32] sm:$0xff]  ;;  %v519_v34 = vld [vmem:[#allocation2 + $0x82] sm:$0xff] }
  0x44   : > { %415 = vrot.lane.b32.xlu0 %v2711_v56, %s2488_s16  ;;  %v521_v36 = vld [vmem:[#allocation2 + $0x9a] sm:$0xff] }
  0x47   : > { %413 = vrot.lane.b32.xlu1 %v332_v63, %s2488_s16  ;;  %v2852_v63 = vld [vmem:[#allocation2 + $0x22] sm:$0xff] }
  0x48   : > { %419 = vrot.lane.b32.xlu0 %v2783_v10, %s2488_s16 }
  0x4b   : > { %417 = vrot.lane.b32.xlu1 %v2794_v13, %s2488_s16 }
  0x4c   : > { %423 = vrot.lane.b32.xlu0 %v337_v14, %s2488_s16  ;;  %v2856_v14 = vld [vmem:[#allocation2 + $0x4a] sm:$0xff] }
  0x4d   : > { %3592 = vst [vmem:[#allocation4_spill] sm:$0xff] %v2856_v14 }
  0x4f   : > { %421 = vrot.lane.b32.xlu1 %v2808_v17, %s2488_s16 }
  0x50   : > { %427 = vrot.lane.b32.xlu0 %v339_v18, %s2488_s16  ;;  %v2860_v18 = vld [vmem:[#allocation2 + $0x3a] sm:$0xff] }
  0x53   : > { %425 = vrot.lane.b32.xlu1 %v338_v21, %s2488_s16  ;;  %v516_v21 = vld [vmem:[#allocation2 + $0x62] sm:$0xff] }
  0x54   : > { %431 = vrot.lane.b32.xlu0 %v341_v22, %s2488_s16  ;;  %v2866_v22 = vld [vmem:[#allocation2 + $0x52] sm:$0xff] }
  0x55   : > { %3593 = vst [vmem:[#allocation5_spill] sm:$0xff] %v2866_v22 }
  0x57   : > { %429 = vrot.lane.b32.xlu1 %v340_v28, %s2488_s16  ;;  %v518_v28 = vld [vmem:[#allocation2 + $0x7a] sm:$0xff] }
  0x58   : > { %435 = vrot.lane.b32.xlu0 %v343_v29, %s2488_s16  ;;  %v517_v29 = vld [vmem:[#allocation2 + $0x6a] sm:$0xff] }
  0x5b   : > { %433 = vrot.lane.b32.xlu1 %v342_v33, %s2488_s16  ;;  %v520_v33 = vld [vmem:[#allocation2 + $0x92] sm:$0xff] }
  0x5c   : > { %439 = vrot.lane.b32.xlu0 %v345_v35, %s2488_s16  ;;  %v522_v35 = vld [vmem:[#allocation2 + $0xaa] sm:$0xff] }
  0x5f   : > { %437 = vrot.lane.b32.xlu1 %v344_v37, %s2488_s16  ;;  %v524_v37 = vld [vmem:[#allocation2 + $0xc2] sm:$0xff] }
  0x60   : > { %572 = vrot.lane.b32.xlu0 %v508_v38, %s2489_s17  ;;  %v523_v38 = vld [vmem:[#allocation2 + $0xb2] sm:$0xff] }
  0x63   : > { %441 = vrot.lane.b32.xlu1 %v346_v45, %s2488_s16  ;;  %v2878_v45 = vld [vmem:[#allocation2 + $0xda] sm:$0xff] }
  0x64   : > { %576 = vrot.lane.b32.xlu0 %v2844_v48, %s2489_s17 }
  0x67   : > { %574 = vrot.lane.b32.xlu1 %v509_v51, %s2489_s17  ;;  %v525_v51 = vld [vmem:[#allocation2 + $0xca] sm:$0xff] }
  0x68   : > { %580 = vrot.lane.b32.xlu0 %v2849_v53, %s2489_s17 }
  0x6b   : > { %578 = vrot.lane.b32.xlu1 %v2852_v63, %s2489_s17 }
  0x6c   : > { %584 = vrot.lane.b32.xlu0 %v2856_v14, %s2489_s17 }
  0x6f   : > { %582 = vrot.lane.b32.xlu1 %v2860_v18, %s2489_s17 }
  0x70   : > { %588 = vrot.lane.b32.xlu0 %v516_v21, %s2489_s17  ;;  %v2883_v21 = vld [vmem:[#allocation2 + $0xf2] sm:$0xff] }
  0x73   : > { %586 = vrot.lane.b32.xlu1 %v2866_v22, %s2489_s17 }
  0x74   : > { %592 = vrot.lane.b32.xlu0 %v518_v28, %s2489_s17  ;;  %v2886_v28 = vld [vmem:[#allocation2 + $0xe2] sm:$0xff] }
  0x77   : > { %590 = vrot.lane.b32.xlu1 %v517_v29, %s2489_s17  ;;  %v2890_v29 = vld [vmem:[#allocation2 + $0x10a] sm:$0xff] }
  0x78   : > { %596 = vrot.lane.b32.xlu0 %v520_v33, %s2489_s17  ;;  %3594 = vst [vmem:[#allocation6_spill] sm:$0xff] %v2890_v29  ;;  %v2894_v33 = vld [vmem:[#allocation2 + $0xfa] sm:$0xff] }
  0x7b   : > { %594 = vrot.lane.b32.xlu1 %v519_v34, %s2489_s17  ;;  %v2898_v34 = vld [vmem:[#allocation2 + $0x122] sm:$0xff] }
  0x7c   : > { %600 = vrot.lane.b32.xlu0 %v522_v35, %s2489_s17  ;;  %3595 = vst [vmem:[#allocation7_spill] sm:$0xff] %v2898_v34  ;;  %v2902_v35 = vld [vmem:[#allocation2 + $0x112] sm:$0xff] }
  0x7d   : > { %3596 = vst [vmem:[#allocation8_spill] sm:$0xff] %v2902_v35 }
  0x7f   : > { %598 = vrot.lane.b32.xlu1 %v521_v36, %s2489_s17  ;;  %v534_v36 = vld [vmem:[#allocation2 + $0x13a] sm:$0xff] }
  0x80   : > { %604 = vrot.lane.b32.xlu0 %v524_v37, %s2489_s17 }
  0x83   : > { %602 = vrot.lane.b32.xlu1 %v523_v38, %s2489_s17  ;;  %v2909_v38 = vld [vmem:[#allocation2 + $0x12a] sm:$0xff] }
  0x84   : > { %608 = vrot.lane.b32.xlu0 %v2878_v45, %s2489_s17  ;;  %3597 = vst [vmem:[#allocation9_spill] sm:$0xff] %v2909_v38 }
  0x86   : > { %v380_v37 = vpop.permute.xlu0 %379 }
  0x87   : > { %606 = vrot.lane.b32.xlu1 %v525_v51, %s2489_s17  ;;  %476 = vst.msk [vmem:[#allocation3] sm:$0xff] %vm475_vm3, %v380_v37  ;;  %v536_v51 = vld [vmem:[#allocation2 + $0x152] sm:$0xff] }
  0x88   : > { %612 = vrot.lane.b32.xlu0 %v2883_v21, %s2489_s17 }
  0x8a   : > { %v382_v22 = vpop.permute.xlu0 %381 }
  0x8b   : > { %610 = vrot.lane.b32.xlu1 %v2886_v28, %s2489_s17  ;;  %477 = vst.msk [vmem:[#allocation3 + $0x8] sm:$0xff] %vm475_vm3, %v382_v22 }
  0x8c   : > { %616 = vrot.lane.b32.xlu0 %v2890_v29, %s2489_s17 }
  0x8f   : > { %614 = vrot.lane.b32.xlu1 %v2894_v33, %s2489_s17 }
  0x90   : > { %620 = vrot.lane.b32.xlu0 %v2898_v34, %s2489_s17  ;;  %v535_v34 = vld [vmem:[#allocation2 + $0x142] sm:$0xff] }
  0x93   : > { %618 = vrot.lane.b32.xlu1 %v2902_v35, %s2489_s17  ;;  %v538_v35 = vld [vmem:[#allocation2 + $0x16a] sm:$0xff] }
  0x94   : > { %624 = vrot.lane.b32.xlu0 %v534_v36, %s2489_s17  ;;  %v537_v36 = vld [vmem:[#allocation2 + $0x15a] sm:$0xff] }
  0x97   : > { %622 = vrot.lane.b32.xlu1 %v2909_v38, %s2489_s17 }
  0x98   : > { %628 = vrot.lane.b32.xlu0 %v536_v51, %s2489_s17  ;;  %v539_v51 = vld [vmem:[#allocation2 + $0x172] sm:$0xff] }
  0x99   : > { %v384_v29 = vpop.permute.xlu1 %383 }
  0x9a   : > { %478 = vst.msk [vmem:[#allocation3 + $0x10] sm:$0xff] %vm475_vm3, %v384_v29  ;;  %v388_v37 = vpop.permute.xlu0 %387 }
  0x9b   : > { %626 = vrot.lane.b32.xlu1 %v535_v34, %s2489_s17  ;;  %480 = vst.msk [vmem:[#allocation3 + $0x20] sm:$0xff] %vm475_vm3, %v388_v37 }
  0x9c   : > { %632 = vrot.lane.b32.xlu0 %v538_v35, %s2489_s17 }
  0x9d   : > { %v386_v14 = vpop.permute.xlu1 %385 }
  0x9e   : > { %479 = vst.msk [vmem:[#allocation3 + $0x18] sm:$0xff] %vm475_vm3, %v386_v14  ;;  %v392_v22 = vpop.permute.xlu0 %391 }
  0x9f   : > { %630 = vrot.lane.b32.xlu1 %v537_v36, %s2489_s17  ;;  %482 = vst.msk [vmem:[#allocation3 + $0x30] sm:$0xff] %vm475_vm3, %v392_v22 }
  0xa0   : > { %765 = vrot.lane.b32.xlu0 %v2686_v47, %s2490_s18 }
  0xa1   : > { %v390_v38 = vpop.permute.xlu1 %389 }
  0xa2   : > { %481 = vst.msk [vmem:[#allocation3 + $0x28] sm:$0xff] %vm475_vm3, %v390_v38  ;;  %v396_v29 = vpop.permute.xlu0 %395 }
  0xa3   : > { %634 = vrot.lane.b32.xlu1 %v539_v51, %s2489_s17  ;;  %484 = vst.msk [vmem:[#allocation3 + $0x40] sm:$0xff] %vm475_vm3, %v396_v29 }
  0xa4   : > { %769 = vrot.lane.b32.xlu0 %v2695_v50, %s2490_s18 }
  0xa5   : > { %v394_v34 = vpop.permute.xlu1 %393 }
  0xa6   : > { %483 = vst.msk [vmem:[#allocation3 + $0x38] sm:$0xff] %vm475_vm3, %v394_v34  ;;  %v400_v14 = vpop.permute.xlu0 %399 }
  0xa7   : > { %767 = vrot.lane.b32.xlu1 %v2693_v49, %s2490_s18  ;;  %486 = vst.msk [vmem:[#allocation3 + $0x50] sm:$0xff] %vm475_vm3, %v400_v14 }
  0xa8   : > { %773 = vrot.lane.b32.xlu0 %v2707_v54, %s2490_s18 }
  0xa9   : > { %v398_v47 = vpop.permute.xlu1 %397 }
  0xaa   : > { %485 = vst.msk [vmem:[#allocation3 + $0x48] sm:$0xff] %vm475_vm3, %v398_v47  ;;  %v404_v35 = vpop.permute.xlu0 %403 }
  0xab   : > { %771 = vrot.lane.b32.xlu1 %v2701_v52, %s2490_s18  ;;  %488 = vst.msk [vmem:[#allocation3 + $0x60] sm:$0xff] %vm475_vm3, %v404_v35 }
  0xac   : > { %777 = vrot.lane.b32.xlu0 %v2717_v57, %s2490_s18 }
  0xad   : > { %v402_v38 = vpop.permute.xlu1 %401 }
  0xae   : > { %487 = vst.msk [vmem:[#allocation3 + $0x58] sm:$0xff] %vm475_vm3, %v402_v38  ;;  %v408_v49 = vpop.permute.xlu0 %407 }
  0xaf   : > { %775 = vrot.lane.b32.xlu1 %v2709_v55, %s2490_s18  ;;  %490 = vst.msk [vmem:[#allocation3 + $0x70] sm:$0xff] %vm475_vm3, %v408_v49 }
  0xb0   : > { %781 = vrot.lane.b32.xlu0 %v2721_v59, %s2490_s18 }
  0xb1   : > { %v406_v37 = vpop.permute.xlu1 %405 }
  0xb2   : > { %489 = vst.msk [vmem:[#allocation3 + $0x68] sm:$0xff] %vm475_vm3, %v406_v37  ;;  %v412_v36 = vpop.permute.xlu0 %411 }
  0xb3   : > { %779 = vrot.lane.b32.xlu1 %v2719_v58, %s2490_s18  ;;  %492 = vst.msk [vmem:[#allocation3 + $0x80] sm:$0xff] %vm475_vm3, %v412_v36 }
  0xb4   : > { %785 = vrot.lane.b32.xlu0 %v2732_v61, %s2490_s18 }
  0xb5   : > { %v410_v22 = vpop.permute.xlu1 %409 }
  0xb6   : > { %491 = vst.msk [vmem:[#allocation3 + $0x78] sm:$0xff] %vm475_vm3, %v410_v22  ;;  %v416_v51 = vpop.permute.xlu0 %415  ;;  %v731_v22 = vld [vmem:[#allocation2 + $0x180] sm:$0xff] }
  0xb7   : > { %783 = vrot.lane.b32.xlu1 %v2730_v60, %s2490_s18  ;;  %494 = vst.msk [vmem:[#allocation3 + $0x90] sm:$0xff] %vm475_vm3, %v416_v51 }
  0xb8   : > { %789 = vrot.lane.b32.xlu0 %v2742_v0, %s2490_s18 }
  0xb9   : > { %v414_v29 = vpop.permute.xlu1 %413 }
  0xba   : > { %493 = vst.msk [vmem:[#allocation3 + $0x88] sm:$0xff] %vm475_vm3, %v414_v29  ;;  %v420_v34 = vpop.permute.xlu0 %419 }
  0xbb   : > { %787 = vrot.lane.b32.xlu1 %v2734_v62, %s2490_s18  ;;  %496 = vst.msk [vmem:[#allocation3 + $0xa0] sm:$0xff] %vm475_vm3, %v420_v34 }
  0xbc   : > { %793 = vrot.lane.b32.xlu0 %v2746_v2, %s2490_s18 }
  0xbd   : > { %v418_v61 = vpop.permute.xlu1 %417 }
  0xbe   : > { %495 = vst.msk [vmem:[#allocation3 + $0x98] sm:$0xff] %vm475_vm3, %v418_v61  ;;  %v424_v14 = vpop.permute.xlu0 %423 }
  0xbf   : > { %791 = vrot.lane.b32.xlu1 %v2744_v1, %s2490_s18  ;;  %498 = vst.msk [vmem:[#allocation3 + $0xb0] sm:$0xff] %vm475_vm3, %v424_v14 }
  0xc0   : > { %797 = vrot.lane.b32.xlu0 %v2757_v4, %s2490_s18 }
  0xc1   : > { %v422_v0 = vpop.permute.xlu1 %421 }
  0xc2   : > { %497 = vst.msk [vmem:[#allocation3 + $0xa8] sm:$0xff] %vm475_vm3, %v422_v0  ;;  %v428_v62 = vpop.permute.xlu0 %427 }
  0xc3   : > { %795 = vrot.lane.b32.xlu1 %v2755_v3, %s2490_s18  ;;  %500 = vst.msk [vmem:[#allocation3 + $0xc0] sm:$0xff] %vm475_vm3, %v428_v62 }
  0xc4   : > { %801 = vrot.lane.b32.xlu0 %v2767_v6, %s2490_s18 }
  0xc5   : > { %v426_v2 = vpop.permute.xlu1 %425 }
  0xc6   : > { %499 = vst.msk [vmem:[#allocation3 + $0xb8] sm:$0xff] %vm475_vm3, %v426_v2  ;;  %v432_v1 = vpop.permute.xlu0 %431 }
  0xc7   : > { %799 = vrot.lane.b32.xlu1 %v2759_v5, %s2490_s18  ;;  %502 = vst.msk [vmem:[#allocation3 + $0xd0] sm:$0xff] %vm475_vm3, %v432_v1 }
  0xc8   : > { %805 = vrot.lane.b32.xlu0 %v2771_v8, %s2490_s18 }
  0xc9   : > { %v430_v4 = vpop.permute.xlu1 %429 }
  0xca   : > { %501 = vst.msk [vmem:[#allocation3 + $0xc8] sm:$0xff] %vm475_vm3, %v430_v4  ;;  %v436_v3 = vpop.permute.xlu0 %435  ;;  %v1896_v4 = vld [vmem:[%s3578_s1 + $0x20] sm:$0xf] }
  0xcb   : > { %803 = vrot.lane.b32.xlu1 %v2769_v7, %s2490_s18  ;;  %504 = vst.msk [vmem:[#allocation3 + $0xe0] sm:$0xff] %vm475_vm3, %v436_v3  ;;  %2394 = vmatprep.subr.msk.mxu0 %vm1994_vm6, %v1896_v4 }
  0xcc   : > { %809 = vrot.lane.b32.xlu0 %v2787_v11, %s2490_s18  ;;  %2452 = vmatprep.subr.msk.mxu1 %vm1994_vm6, %v1896_v4 }
  0xcd   : > { %v434_v47 = vpop.permute.xlu1 %433  ;;  %2395 = vmatpush3.msk.msra.mxu0 %vm1994_vm6, %v1896_v4  ;;  %2457 = vmatpush3.msk.msra.mxu1 %vm1994_vm6, %v1896_v4 }
  0xce   : > { %503 = vst.msk [vmem:[#allocation3 + $0xd8] sm:$0xff] %vm475_vm3, %v434_v47  ;;  %v440_v5 = vpop.permute.xlu0 %439 }
  0xcf   : > { %807 = vrot.lane.b32.xlu1 %v2781_v9, %s2490_s18  ;;  %506 = vst.msk [vmem:[#allocation3 + $0xf0] sm:$0xff] %vm475_vm3, %v440_v5  ;;  %v1894_v5 = vld [vmem:[%s3578_s1 + $0x10] sm:$0xff] }
  0xd0   : > { %813 = vrot.lane.b32.xlu0 %v2800_v15, %s2490_s18 }
  0xd1   : > { %v438_v35 = vpop.permute.xlu1 %437 }
  0xd2   : > { %505 = vst.msk [vmem:[#allocation3 + $0xe8] sm:$0xff] %vm475_vm3, %v438_v35  ;;  %v573_v38 = vpop.permute.xlu0 %572 }
  0xd3   : > { %811 = vrot.lane.b32.xlu1 %v2792_v12, %s2490_s18  ;;  %669 = vst.msk [vmem:[#allocation3] sm:$0xff] %vm668_vm4, %v573_v38  ;;  %v1893_v38 = vld [vmem:[%s3578_s1 + $0x8] sm:$0xff] }
  0xd4   : > { %817 = vrot.lane.b32.xlu0 %v2813_v19, %s2490_s18 }
  0xd5   : > { %v442_v49 = vpop.permute.xlu1 %441 }
  0xd6   : > { %507 = vst.msk [vmem:[#allocation3 + $0xf8] sm:$0xff] %vm475_vm3, %v442_v49  ;;  %v577_v37 = vpop.permute.xlu0 %576 }
  0xd7   : > { %815 = vrot.lane.b32.xlu1 %v2806_v16, %s2490_s18  ;;  %671 = vst.msk [vmem:[#allocation3 + $0x10] sm:$0xff] %vm668_vm4, %v577_v37  ;;  %v1892_v37 = vld [vmem:[%s3578_s1] sm:$0xff] }
  0xd8   : > { %821 = vrot.lane.b32.xlu0 %v2824_v23, %s2490_s18  ;;  %v732_v23 = vld [vmem:[#allocation2 + $0x188] sm:$0xff] }
  0xd9   : > { %v575_v36 = vpop.permute.xlu1 %574 }
  0xda   : > { %670 = vst.msk [vmem:[#allocation3 + $0x8] sm:$0xff] %vm668_vm4, %v575_v36  ;;  %v581_v51 = vpop.permute.xlu0 %580 }
  0xdb   : > { %819 = vrot.lane.b32.xlu1 %v2819_v20, %s2490_s18  ;;  %673 = vst.msk [vmem:[#allocation3 + $0x20] sm:$0xff] %vm668_vm4, %v581_v51 }
  0xdc   : > { %825 = vrot.lane.b32.xlu0 %v731_v22, %s2490_s18 }
  0xdd   : > { %v579_v29 = vpop.permute.xlu1 %578 }
  0xde   : > { %672 = vst.msk [vmem:[#allocation3 + $0x18] sm:$0xff] %vm668_vm4, %v579_v29  ;;  %v585_v34 = vpop.permute.xlu0 %584 }
  0xdf   : > { %823 = vrot.lane.b32.xlu1 %v2829_v24, %s2490_s18  ;;  %675 = vst.msk [vmem:[#allocation3 + $0x30] sm:$0xff] %vm668_vm4, %v585_v34 }
  0xe0   : > { %958 = vrot.lane.b32.xlu0 %v2618_v25, %s2491_s19 }
  0xe1   : > { %v583_v61 = vpop.permute.xlu1 %582 }
  0xe2   : > { %674 = vst.msk [vmem:[#allocation3 + $0x28] sm:$0xff] %vm668_vm4, %v583_v61  ;;  %v589_v14 = vpop.permute.xlu0 %588 }
  0xe3   : > { %827 = vrot.lane.b32.xlu1 %v732_v23, %s2490_s18  ;;  %677 = vst.msk [vmem:[#allocation3 + $0x40] sm:$0xff] %vm668_vm4, %v589_v14 }
  0xe4   : > { %962 = vrot.lane.b32.xlu0 %v2620_v26, %s2491_s19 }
  0xe5   : > { %v587_v0 = vpop.permute.xlu1 %586 }
  0xe6   : > { %676 = vst.msk [vmem:[#allocation3 + $0x38] sm:$0xff] %vm668_vm4, %v587_v0  ;;  %v593_v24 = vpop.permute.xlu0 %592  ;;  %v1493_v0 = vld [vmem:[#allocation2 + $0x111] sm:$0xff] }
  0xe7   : > { %960 = vrot.lane.b32.xlu1 %v2627_v27, %s2491_s19  ;;  %679 = vst.msk [vmem:[#allocation3 + $0x50] sm:$0xff] %vm668_vm4, %v593_v24 }
  0xe8   : > { %966 = vrot.lane.b32.xlu0 %v2635_v30, %s2491_s19 }
  0xe9   : > { %v591_v25 = vpop.permute.xlu1 %590 }
  0xea   : > { %678 = vst.msk [vmem:[#allocation3 + $0x48] sm:$0xff] %vm668_vm4, %v591_v25  ;;  %v597_v62 = vpop.permute.xlu0 %596  ;;  %v3598_v25 = vld [vmem:[#allocation4_spill] sm:$0xff] }
  0xeb   : > { %964 = vrot.lane.b32.xlu1 %v2639_v31, %s2491_s19  ;;  %681 = vst.msk [vmem:[#allocation3 + $0x60] sm:$0xff] %vm668_vm4, %v597_v62 }
  0xec   : > { %970 = vrot.lane.b32.xlu0 %v2643_v32, %s2491_s19 }
  0xed   : > { %v595_v26 = vpop.permute.xlu1 %594 }
  0xee   : > { %680 = vst.msk [vmem:[#allocation3 + $0x58] sm:$0xff] %vm668_vm4, %v595_v26  ;;  %v601_v27 = vpop.permute.xlu0 %600 }
  0xef   : > { %968 = vrot.lane.b32.xlu1 %v2656_v39, %s2491_s19  ;;  %683 = vst.msk [vmem:[#allocation3 + $0x70] sm:$0xff] %vm668_vm4, %v601_v27  ;;  %v3599_v27 = vld [vmem:[#allocation6_spill] sm:$0xff] }
  0xf0   : > { %974 = vrot.lane.b32.xlu0 %v2663_v40, %s2491_s19 }
  0xf1   : > { %v599_v30 = vpop.permute.xlu1 %598 }
  0xf2   : > { %682 = vst.msk [vmem:[#allocation3 + $0x68] sm:$0xff] %vm668_vm4, %v599_v30  ;;  %v605_v31 = vpop.permute.xlu0 %604 }
  0xf3   : > { %972 = vrot.lane.b32.xlu1 %v2667_v41, %s2491_s19  ;;  %685 = vst.msk [vmem:[#allocation3 + $0x80] sm:$0xff] %vm668_vm4, %v605_v31 }
  0xf4   : > { %978 = vrot.lane.b32.xlu0 %v2671_v42, %s2491_s19 }
  0xf5   : > { %v603_v32 = vpop.permute.xlu1 %602 }
  0xf6   : > { %684 = vst.msk [vmem:[#allocation3 + $0x78] sm:$0xff] %vm668_vm4, %v603_v32  ;;  %v609_v39 = vpop.permute.xlu0 %608 }
  0xf7   : > { %976 = vrot.lane.b32.xlu1 %v2675_v43, %s2491_s19  ;;  %687 = vst.msk [vmem:[#allocation3 + $0x90] sm:$0xff] %vm668_vm4, %v609_v39 }
  0xf8   : > { %982 = vrot.lane.b32.xlu0 %v2679_v44, %s2491_s19 }
  0xf9   : > { %v607_v40 = vpop.permute.xlu1 %606 }
  0xfa   : > { %686 = vst.msk [vmem:[#allocation3 + $0x88] sm:$0xff] %vm668_vm4, %v607_v40  ;;  %v613_v41 = vpop.permute.xlu0 %612  ;;  %v3600_v40 = vld [vmem:[#allocation8_spill] sm:$0xff] }
  0xfb   : > { %980 = vrot.lane.b32.xlu1 %v2683_v46, %s2491_s19  ;;  %689 = vst.msk [vmem:[#allocation3 + $0xa0] sm:$0xff] %vm668_vm4, %v613_v41  ;;  %v3601_v41 = vld [vmem:[#allocation5_spill] sm:$0xff] }
  0xfc   : > { %992 = vrot.lane.b32.xlu0 %v2794_v13, %s2491_s19 }
  0xfd   : > { %v611_v42 = vpop.permute.xlu1 %610 }
  0xfe   : > { %688 = vst.msk [vmem:[#allocation3 + $0x98] sm:$0xff] %vm668_vm4, %v611_v42  ;;  %v617_v43 = vpop.permute.xlu0 %616 }
  0xff   : > { %990 = vrot.lane.b32.xlu1 %v2711_v56, %s2491_s19  ;;  %691 = vst.msk [vmem:[#allocation3 + $0xb0] sm:$0xff] %vm668_vm4, %v617_v43 }
 0x100   : > { %1183 = vrot.lane.b32.xlu0 %v2878_v45, %s2492_s20 }
 0x101   : > { %v615_v44 = vpop.permute.xlu1 %614 }
 0x102   : > { %690 = vst.msk [vmem:[#allocation3 + $0xa8] sm:$0xff] %vm668_vm4, %v615_v44  ;;  %v621_v46 = vpop.permute.xlu0 %620 }
 0x103   : > { %1151 = vrot.lane.b32.xlu1 %v2844_v48, %s2492_s20  ;;  %693 = vst.msk [vmem:[#allocation3 + $0xc0] sm:$0xff] %vm668_vm4, %v621_v46 }
 0x104   : > { %1185 = vrot.lane.b32.xlu0 %v2886_v28, %s2492_s20 }
 0x105   : > { %v619_v13 = vpop.permute.xlu1 %618 }
 0x106   : > { %692 = vst.msk [vmem:[#allocation3 + $0xb8] sm:$0xff] %vm668_vm4, %v619_v13  ;;  %v625_v56 = vpop.permute.xlu0 %624 }
 0x107   : > { %1153 = vrot.lane.b32.xlu1 %v2852_v63, %s2492_s20  ;;  %695 = vst.msk [vmem:[#allocation3 + $0xd0] sm:$0xff] %vm668_vm4, %v625_v56 }
 0x108   : > { %1377 = vrot.lane.b32.xlu0 %v2767_v6, %s2493_s21  ;;  %v1474_v6 = vld [vmem:[#allocation2 + $0x31] sm:$0xff] }
 0x109   : > { %v623_v45 = vpop.permute.xlu1 %622 }
 0x10a   : > { %694 = vst.msk [vmem:[#allocation3 + $0xc8] sm:$0xff] %vm668_vm4, %v623_v45  ;;  %v629_v48 = vpop.permute.xlu0 %628  ;;  %v1494_v45 = vld [vmem:[#allocation2 + $0x121] sm:$0xff] }
 0x10b   : > { %1345 = vrot.lane.b32.xlu1 %v2695_v50, %s2493_s21  ;;  %697 = vst.msk [vmem:[#allocation3 + $0xe0] sm:$0xff] %vm668_vm4, %v629_v48  ;;  %v1475_v50 = vld [vmem:[#allocation2 + $0x39] sm:$0xff]  ;;  %v1478_v48 = vld [vmem:[#allocation2 + $0x61] sm:$0xff] }
 0x10c   : > { %1379 = vrot.lane.b32.xlu0 %v2769_v7, %s2493_s21 }
 0x10d   : > { %v627_v28 = vpop.permute.xlu1 %626 }
 0x10e   : > { %696 = vst.msk [vmem:[#allocation3 + $0xd8] sm:$0xff] %vm668_vm4, %v627_v28  ;;  %v633_v63 = vpop.permute.xlu0 %632 }
 0x10f   : > { %1347 = vrot.lane.b32.xlu1 %v2701_v52, %s2493_s21  ;;  %699 = vst.msk [vmem:[#allocation3 + $0xf0] sm:$0xff] %vm668_vm4, %v633_v63 }
 0x110   : > { %1570 = vrot.lane.b32.xlu0 %v2783_v10, %s2494_s22 }
 0x111   : > { %v631_v2 = vpop.permute.xlu1 %630 }
 0x112   : > { %698 = vst.msk [vmem:[#allocation3 + $0xe8] sm:$0xff] %vm668_vm4, %v631_v2  ;;  %v766_v7 = vpop.permute.xlu0 %765  ;;  %v1495_v2 = vld [vmem:[#allocation2 + $0x129] sm:$0xff] }
 0x113   : > { %1538 = vrot.lane.b32.xlu1 %v1474_v6, %s2494_s22  ;;  %862 = vst.msk [vmem:[#allocation3] sm:$0xff] %vm861_vm5, %v766_v7 }
 0x114   : > { %1540 = vrot.lane.b32.xlu0 %v1475_v50, %s2494_s22 }
 0x115   : > { %v635_v1 = vpop.permute.xlu1 %634 }
 0x116   : > { %700 = vst.msk [vmem:[#allocation3 + $0xf8] sm:$0xff] %vm668_vm4, %v635_v1  ;;  %v770_v52 = vpop.permute.xlu0 %769 }
 0x117   : > { %994 = vrot.lane.b32.xlu1 %v2783_v10, %s2491_s19  ;;  %864 = vst.msk [vmem:[#allocation3 + $0x10] sm:$0xff] %vm861_vm5, %v770_v52  ;;  %v1895_v10 = vld [vmem:[%s3578_s1 + $0x18] sm:$0xff]  ;;  %v3602_v52 = vld [vmem:[#allocation7_spill] sm:$0xff] }
 0x118   : > { %1731 = vrot.lane.b32.xlu0 %v2849_v53, %s2495_s25  ;;  %2396 = vmatprep.subr.mxu0 %v1895_v10 }
 0x119   : > { %v768_v3 = vpop.permute.xlu1 %767  ;;  %2397 = vmatpush3.msra.mxu0 %v1895_v10  ;;  %2453 = vmatprep.subr.mxu1 %v1895_v10 }
 0x11a   : > { %863 = vst.msk [vmem:[#allocation3 + $0x8] sm:$0xff] %vm861_vm5, %v768_v3  ;;  %v774_v47 = vpop.permute.xlu0 %773  ;;  %2398 = vmatprep.subr.mxu0 %v1894_v5  ;;  %2458 = vmatpush3.msra.mxu1 %v1895_v10 }
 0x11b   : > { %1572 = vrot.lane.b32.xlu1 %v2808_v17, %s2494_s22  ;;  %866 = vst.msk [vmem:[#allocation3 + $0x20] sm:$0xff] %vm861_vm5, %v774_v47  ;;  %2399 = vmatpush3.msra.mxu0 %v1894_v5  ;;  %v1672_v47 = vld [vmem:[#allocation2 + $0x6a] sm:$0xff] }
 0x11c   : > { %996 = vrot.lane.b32.xlu0 %v2808_v17, %s2491_s19  ;;  %2454 = vmatprep.subr.mxu1 %v1894_v5 }
 0x11d   : > { %v772_v35 = vpop.permute.xlu1 %771  ;;  %2400 = vmatprep.subr.mxu0 %v1893_v38  ;;  %2459 = vmatpush3.msra.mxu1 %v1894_v5 }
 0x11e   : > { %865 = vst.msk [vmem:[#allocation3 + $0x18] sm:$0xff] %vm861_vm5, %v772_v35  ;;  %v778_v49 = vpop.permute.xlu0 %777  ;;  %2401 = vmatpush3.msra.mxu0 %v1893_v38  ;;  %2455 = vmatprep.subr.mxu1 %v1893_v38  ;;  %v3603_v35 = vld [vmem:[#allocation9_spill] sm:$0xff] }
 0x11f   : > { %1763 = vrot.lane.b32.xlu1 %v2883_v21, %s2495_s25  ;;  %868 = vst.msk [vmem:[#allocation3 + $0x30] sm:$0xff] %vm861_vm5, %v778_v49  ;;  %2402 = vmatprep.subr.mxu0 %v1892_v37 }
 0x120   : > { %1187 = vrot.lane.b32.xlu0 %v2883_v21, %s2492_s20  ;;  %2460 = vmatpush3.msra.mxu1 %v1893_v38  ;;  %v1110_v38 = vld [vmem:[#allocation2 + $0x12a] sm:$0xff] }
 0x121   : > { %v776_v17 = vpop.permute.xlu1 %775  ;;  %2403 = vmatpush3.msra.mxu0 %v1892_v37  ;;  %2456 = vmatprep.subr.mxu1 %v1892_v37 }
 0x122   : > { %867 = vst.msk [vmem:[#allocation3 + $0x28] sm:$0xff] %vm861_vm5, %v776_v17  ;;  %v782_v36 = vpop.permute.xlu0 %781  ;;  %2461 = vmatpush3.msra.mxu1 %v1892_v37 }
 0x123   : > { %1155 = vrot.lane.b32.xlu1 %v2849_v53, %s2492_s20  ;;  %870 = vst.msk [vmem:[#allocation3 + $0x40] sm:$0xff] %vm861_vm5, %v782_v36 }
 0x124   : > { %1765 = vrot.lane.b32.xlu0 %v2894_v33, %s2495_s25 }
 0x125   : > { %v780_v22 = vpop.permute.xlu1 %779 }
 0x126   : > { %869 = vst.msk [vmem:[#allocation3 + $0x38] sm:$0xff] %vm861_vm5, %v780_v22  ;;  %v786_v21 = vpop.permute.xlu0 %785 }
 0x127   : > { %1733 = vrot.lane.b32.xlu1 %v2860_v18, %s2495_s25  ;;  %872 = vst.msk [vmem:[#allocation3 + $0x50] sm:$0xff] %vm861_vm5, %v786_v21 }
 0x128   : > { %1189 = vrot.lane.b32.xlu0 %v2894_v33, %s2492_s20 }
 0x129   : > { %v784_v51 = vpop.permute.xlu1 %783 }
 0x12a   : > { %871 = vst.msk [vmem:[#allocation3 + $0x48] sm:$0xff] %vm861_vm5, %v784_v51  ;;  %v790_v53 = vpop.permute.xlu0 %789  ;;  %v1496_v51 = vld [vmem:[#allocation2 + $0x139] sm:$0xff] }
 0x12b   : > { %1157 = vrot.lane.b32.xlu1 %v2860_v18, %s2492_s20  ;;  %874 = vst.msk [vmem:[#allocation3 + $0x60] sm:$0xff] %vm861_vm5, %v790_v53  ;;  %v1492_v18 = vld [vmem:[#allocation2 + $0x109] sm:$0xff]  ;;  %v1480_v53 = vld [vmem:[#allocation2 + $0x79] sm:$0xff] }
 0x12c   : > { %1381 = vrot.lane.b32.xlu0 %v2771_v8, %s2493_s21  ;;  %v1476_v8 = vld [vmem:[#allocation2 + $0x49] sm:$0xff] }
 0x12d   : > { %v788_v29 = vpop.permute.xlu1 %787 }
 0x12e   : > { %873 = vst.msk [vmem:[#allocation3 + $0x58] sm:$0xff] %vm861_vm5, %v788_v29  ;;  %v794_v34 = vpop.permute.xlu0 %793 }
 0x12f   : > { %1349 = vrot.lane.b32.xlu1 %v2707_v54, %s2493_s21  ;;  %876 = vst.msk [vmem:[#allocation3 + $0x70] sm:$0xff] %vm861_vm5, %v794_v34  ;;  %v1477_v54 = vld [vmem:[#allocation2 + $0x51] sm:$0xff] }
 0x130   : > { %1383 = vrot.lane.b32.xlu0 %v2781_v9, %s2493_s21 }
 0x131   : > { %v792_v33 = vpop.permute.xlu1 %791 }
 0x132   : > { %875 = vst.msk [vmem:[#allocation3 + $0x68] sm:$0xff] %vm861_vm5, %v792_v33  ;;  %v798_v23 = vpop.permute.xlu0 %797 }
 0x133   : > { %1351 = vrot.lane.b32.xlu1 %v2709_v55, %s2493_s21  ;;  %878 = vst.msk [vmem:[#allocation3 + $0x80] sm:$0xff] %vm861_vm5, %v798_v23 }
 0x134   : > { %1574 = vrot.lane.b32.xlu0 %v1492_v18, %s2494_s22 }
 0x135   : > { %v796_v61 = vpop.permute.xlu1 %795 }
 0x136   : > { %877 = vst.msk [vmem:[#allocation3 + $0x78] sm:$0xff] %vm861_vm5, %v796_v61  ;;  %v802_v14 = vpop.permute.xlu0 %801  ;;  %v1689_v61 = vld [vmem:[#allocation2 + $0x13a] sm:$0xff] }
 0x137   : > { %1542 = vrot.lane.b32.xlu1 %v1476_v8, %s2494_s22  ;;  %880 = vst.msk [vmem:[#allocation3 + $0x90] sm:$0xff] %vm861_vm5, %v802_v14 }
 0x138   : > { %1544 = vrot.lane.b32.xlu0 %v1477_v54, %s2494_s22 }
 0x139   : > { %v800_v9 = vpop.permute.xlu1 %799 }
 0x13a   : > { %879 = vst.msk [vmem:[#allocation3 + $0x88] sm:$0xff] %vm861_vm5, %v800_v9  ;;  %v806_v55 = vpop.permute.xlu0 %805 }
 0x13b   : > { %998 = vrot.lane.b32.xlu1 %v1492_v18, %s2491_s19  ;;  %882 = vst.msk [vmem:[#allocation3 + $0xa0] sm:$0xff] %vm861_vm5, %v806_v55  ;;  %v1497_v18 = vld [vmem:[#allocation2 + $0x141] sm:$0xff] }
 0x13c   : > { %1735 = vrot.lane.b32.xlu0 %v3598_v25, %s2495_s25  ;;  %v1690_v55 = vld [vmem:[#allocation2 + $0x142] sm:$0xff] }
 0x13d   : > { %v804_v24 = vpop.permute.xlu1 %803 }
 0x13e   : > { %881 = vst.msk [vmem:[#allocation3 + $0x98] sm:$0xff] %vm861_vm5, %v804_v24  ;;  %v810_v62 = vpop.permute.xlu0 %809  ;;  %v1674_v24 = vld [vmem:[#allocation2 + $0x82] sm:$0xff] }
 0x13f   : > { %1576 = vrot.lane.b32.xlu1 %v1493_v0, %s2494_s22  ;;  %884 = vst.msk [vmem:[#allocation3 + $0xb0] sm:$0xff] %vm861_vm5, %v810_v62 }
 0x140   : > { %1000 = vrot.lane.b32.xlu0 %v1493_v0, %s2491_s19 }
 0x141   : > { %v808_v26 = vpop.permute.xlu1 %807 }
 0x142   : > { %883 = vst.msk [vmem:[#allocation3 + $0xa8] sm:$0xff] %vm861_vm5, %v808_v26  ;;  %v814_v30 = vpop.permute.xlu0 %813 }
 0x143   : > { %1767 = vrot.lane.b32.xlu1 %v3599_v27, %s2495_s25  ;;  %886 = vst.msk [vmem:[#allocation3 + $0xc0] sm:$0xff] %vm861_vm5, %v814_v30 }
 0x144   : > { %1191 = vrot.lane.b32.xlu0 %v3599_v27, %s2492_s20 }
 0x145   : > { %v812_v31 = vpop.permute.xlu1 %811 }
 0x146   : > { %885 = vst.msk [vmem:[#allocation3 + $0xb8] sm:$0xff] %vm861_vm5, %v812_v31  ;;  %v818_v32 = vpop.permute.xlu0 %817  ;;  %v1289_v31 = vld [vmem:[#allocation2 + $0x90] sm:$0xff] }
 0x147   : > { %1159 = vrot.lane.b32.xlu1 %v3598_v25, %s2492_s20  ;;  %888 = vst.msk [vmem:[#allocation3 + $0xd0] sm:$0xff] %vm861_vm5, %v818_v32 }
 0x148   : > { %1769 = vrot.lane.b32.xlu0 %v3600_v40, %s2495_s25 }
 0x149   : > { %v816_v39 = vpop.permute.xlu1 %815 }
 0x14a   : > { %887 = vst.msk [vmem:[#allocation3 + $0xc8] sm:$0xff] %vm861_vm5, %v816_v39  ;;  %v822_v42 = vpop.permute.xlu0 %821 }
 0x14b   : > { %1737 = vrot.lane.b32.xlu1 %v3601_v41, %s2495_s25  ;;  %890 = vst.msk [vmem:[#allocation3 + $0xe0] sm:$0xff] %vm861_vm5, %v822_v42 }
 0x14c   : > { %1193 = vrot.lane.b32.xlu0 %v3600_v40, %s2492_s20 }
 0x14d   : > { %v820_v43 = vpop.permute.xlu1 %819 }
 0x14e   : > { %889 = vst.msk [vmem:[#allocation3 + $0xd8] sm:$0xff] %vm861_vm5, %v820_v43  ;;  %v826_v44 = vpop.permute.xlu0 %825  ;;  %v1498_v43 = vld [vmem:[#allocation2 + $0x151] sm:$0xff] }
 0x14f   : > { %1161 = vrot.lane.b32.xlu1 %v3601_v41, %s2492_s20  ;;  %892 = vst.msk [vmem:[#allocation3 + $0xf0] sm:$0xff] %vm861_vm5, %v826_v44  ;;  %v1290_v41 = vld [vmem:[#allocation2 + $0x98] sm:$0xff] }
 0x150   : > { %1385 = vrot.lane.b32.xlu0 %v2787_v11, %s2493_s21 }
 0x151   : > { %v824_v46 = vpop.permute.xlu1 %823 }
 0x152   : > { %891 = vst.msk [vmem:[#allocation3 + $0xe8] sm:$0xff] %vm861_vm5, %v824_v46  ;;  %v959_v13 = vpop.permute.xlu0 %958  ;;  %v1482_v46 = vld [vmem:[#allocation2 + $0x91] sm:$0xff] }
 0x153   : > { %1353 = vrot.lane.b32.xlu1 %v2717_v57, %s2493_s21  ;;  %1055 = vst.msk [vmem:[#allocation3] sm:$0xff] %vm1054_vm7, %v959_v13  ;;  %v1479_v57 = vld [vmem:[#allocation2 + $0x69] sm:$0xff] }
 0x154   : > { %1387 = vrot.lane.b32.xlu0 %v2792_v12, %s2493_s21 }
 0x155   : > { %v828_v56 = vpop.permute.xlu1 %827 }
 0x156   : > { %893 = vst.msk [vmem:[#allocation3 + $0xf8] sm:$0xff] %vm861_vm5, %v828_v56  ;;  %v963_v11 = vpop.permute.xlu0 %962 }
 0x157   : > { %1355 = vrot.lane.b32.xlu1 %v2719_v58, %s2493_s21  ;;  %1057 = vst.msk [vmem:[#allocation3 + $0x10] sm:$0xff] %vm1054_vm7, %v963_v11  ;;  %v1671_v58 = vld [vmem:[#allocation2 + $0x62] sm:$0xff] }
 0x158   : > { %1578 = vrot.lane.b32.xlu0 %v1494_v45, %s2494_s22 }
 0x159   : > { %v961_v28 = vpop.permute.xlu1 %960 }
 0x15a   : > { %1056 = vst.msk [vmem:[#allocation3 + $0x8] sm:$0xff] %vm1054_vm7, %v961_v28  ;;  %v967_v63 = vpop.permute.xlu0 %966 }
 0x15b   : > { %1546 = vrot.lane.b32.xlu1 %v1478_v48, %s2494_s22  ;;  %1059 = vst.msk [vmem:[#allocation3 + $0x20] sm:$0xff] %vm1054_vm7, %v967_v63  ;;  %v1675_v48 = vld [vmem:[#allocation2 + $0x92] sm:$0xff] }
 0x15c   : > { %1548 = vrot.lane.b32.xlu0 %v1479_v57, %s2494_s22  ;;  %v1499_v57 = vld [vmem:[#allocation2 + $0x159] sm:$0xff] }
 0x15d   : > { %v965_v12 = vpop.permute.xlu1 %964 }
 0x15e   : > { %1058 = vst.msk [vmem:[#allocation3 + $0x18] sm:$0xff] %vm1054_vm7, %v965_v12  ;;  %v971_v6 = vpop.permute.xlu0 %970 }
 0x15f   : > { %1002 = vrot.lane.b32.xlu1 %v1494_v45, %s2491_s19  ;;  %1061 = vst.msk [vmem:[#allocation3 + $0x30] sm:$0xff] %vm1054_vm7, %v971_v6 }
 0x160   : > { %1739 = vrot.lane.b32.xlu0 %v1671_v58, %s2495_s25 }
 0x161   : > { %v969_v50 = vpop.permute.xlu1 %968 }
 0x162   : > { %1060 = vst.msk [vmem:[#allocation3 + $0x28] sm:$0xff] %vm1054_vm7, %v969_v50  ;;  %v975_v7 = vpop.permute.xlu0 %974 }
 0x163   : > { %1580 = vrot.lane.b32.xlu1 %v1495_v2, %s2494_s22  ;;  %1063 = vst.msk [vmem:[#allocation3 + $0x40] sm:$0xff] %vm1054_vm7, %v975_v7  ;;  %v1692_v7 = vld [vmem:[#allocation2 + $0x15a] sm:$0xff] }
 0x164   : > { %1004 = vrot.lane.b32.xlu0 %v1495_v2, %s2491_s19 }
 0x165   : > { %v973_v1 = vpop.permute.xlu1 %972 }
 0x166   : > { %1062 = vst.msk [vmem:[#allocation3 + $0x38] sm:$0xff] %vm1054_vm7, %v973_v1  ;;  %v979_v4 = vpop.permute.xlu0 %978 }
 0x167   : > { %1771 = vrot.lane.b32.xlu1 %v3602_v52, %s2495_s25  ;;  %1065 = vst.msk [vmem:[#allocation3 + $0x50] sm:$0xff] %vm1054_vm7, %v979_v4 }
 0x168   : > { %1195 = vrot.lane.b32.xlu0 %v3602_v52, %s2492_s20  ;;  %v1676_v52 = vld [vmem:[#allocation2 + $0x9a] sm:$0xff] }
 0x169   : > { %v977_v3 = vpop.permute.xlu1 %976 }
 0x16a   : > { %1064 = vst.msk [vmem:[#allocation3 + $0x48] sm:$0xff] %vm1054_vm7, %v977_v3  ;;  %v983_v10 = vpop.permute.xlu0 %982 }
 0x16b   : > { %1163 = vrot.lane.b32.xlu1 %v1671_v58, %s2492_s20  ;;  %1067 = vst.msk [vmem:[#allocation3 + $0x60] sm:$0xff] %vm1054_vm7, %v983_v10  ;;  %v1691_v58 = vld [vmem:[#allocation2 + $0x152] sm:$0xff] }
 0x16c   : > { %1773 = vrot.lane.b32.xlu0 %v3603_v35, %s2495_s25 }
 0x16d   : > { %v981_v5 = vpop.permute.xlu1 %980 }
 0x16e   : > { %1066 = vst.msk [vmem:[#allocation3 + $0x58] sm:$0xff] %vm1054_vm7, %v981_v5  ;;  %v993_v49 = vpop.permute.xlu0 %992  ;;  %v1307_v5 = vld [vmem:[#allocation2 + $0x168] sm:$0xff] }
 0x16f   : > { %1741 = vrot.lane.b32.xlu1 %v1672_v47, %s2495_s25  ;;  %1072 = vst.msk [vmem:[#allocation3 + $0x88] sm:$0xff] %vm1054_vm7, %v993_v49 }
 0x170   : > { %1197 = vrot.lane.b32.xlu0 %v1110_v38, %s2492_s20  ;;  %v1291_v38 = vld [vmem:[#allocation2 + $0xa8] sm:$0xff] }
 0x171   : > { %v991_v37 = vpop.permute.xlu1 %990 }
 0x172   : > { %1071 = vst.msk [vmem:[#allocation3 + $0x80] sm:$0xff] %vm1054_vm7, %v991_v37  ;;  %v1184_v17 = vpop.permute.xlu0 %1183 }
 0x173   : > { %1165 = vrot.lane.b32.xlu1 %v1672_v47, %s2492_s20  ;;  %1264 = vst.msk [vmem:[#allocation3 + $0x80] sm:$0xff] %vm1247_vm8, %v1184_v17  ;;  %v1308_v17 = vld [vmem:[#allocation2 + $0x170] sm:$0xff] }
 0x174   : > { %1389 = vrot.lane.b32.xlu0 %v2800_v15, %s2493_s21 }
 0x175   : > { %v1152_v36 = vpop.permute.xlu1 %1151 }
 0x176   : > { %1248 = vst.msk [vmem:[#allocation3] sm:$0xff] %vm1247_vm8, %v1152_v36  ;;  %v1186_v22 = vpop.permute.xlu0 %1185 }
 0x177   : > { %1357 = vrot.lane.b32.xlu1 %v2721_v59, %s2493_s21  ;;  %1265 = vst.msk [vmem:[#allocation3 + $0x88] sm:$0xff] %vm1247_vm8, %v1186_v22  ;;  %v1481_v59 = vld [vmem:[#allocation2 + $0x81] sm:$0xff]  ;;  %v1292_v22 = vld [vmem:[#allocation2 + $0xb0] sm:$0xff] }
 0x178   : > { %1391 = vrot.lane.b32.xlu0 %v2806_v16, %s2493_s21 }
 0x179   : > { %v1154_v21 = vpop.permute.xlu1 %1153 }
 0x17a   : > { %1249 = vst.msk [vmem:[#allocation3 + $0x8] sm:$0xff] %vm1247_vm8, %v1154_v21  ;;  %v1378_v15 = vpop.permute.xlu0 %1377 }
 0x17b   : > { %1359 = vrot.lane.b32.xlu1 %v2730_v60, %s2493_s21  ;;  %1458 = vst.msk [vmem:[#allocation3 + $0x80] sm:$0xff] %vm1441_vm9, %v1378_v15  ;;  %v1673_v60 = vld [vmem:[#allocation2 + $0x7a] sm:$0xff] }
 0x17c   : > { %1582 = vrot.lane.b32.xlu0 %v1496_v51, %s2494_s22 }
 0x17d   : > { %v1346_v29 = vpop.permute.xlu1 %1345 }
 0x17e   : > { %1442 = vst.msk [vmem:[#allocation3] sm:$0xff] %vm1441_vm9, %v1346_v29  ;;  %v1380_v16 = vpop.permute.xlu0 %1379  ;;  %v1484_v29 = vld [vmem:[#allocation2 + $0xa9] sm:$0xff] }
 0x17f   : > { %1550 = vrot.lane.b32.xlu1 %v1480_v53, %s2494_s22  ;;  %1459 = vst.msk [vmem:[#allocation3 + $0x88] sm:$0xff] %vm1441_vm9, %v1380_v16 }
 0x180   : > { %1552 = vrot.lane.b32.xlu0 %v1481_v59, %s2494_s22 }
 0x181   : > { %v1348_v34 = vpop.permute.xlu1 %1347 }
 0x182   : > { %1443 = vst.msk [vmem:[#allocation3 + $0x8] sm:$0xff] %vm1441_vm9, %v1348_v34  ;;  %v1571_v33 = vpop.permute.xlu0 %1570  ;;  %v1485_v34 = vld [vmem:[#allocation2 + $0xb1] sm:$0xff] }
 0x183   : > { %1006 = vrot.lane.b32.xlu1 %v1496_v51, %s2491_s19  ;;  %1651 = vst.msk [vmem:[#allocation3 + $0x80] sm:$0xff] %vm1634_vm10, %v1571_v33  ;;  %v1500_v51 = vld [vmem:[#allocation2 + $0x169] sm:$0xff] }
 0x184   : > { %1743 = vrot.lane.b32.xlu0 %v1673_v60, %s2495_s25 }
 0x185   : > { %v1539_v23 = vpop.permute.xlu1 %1538 }
 0x186   : > { %1635 = vst.msk [vmem:[#allocation3] sm:$0xff] %vm1634_vm10, %v1539_v23  ;;  %v1541_v8 = vpop.permute.xlu0 %1540 }
 0x187   : > { %1584 = vrot.lane.b32.xlu1 %v1497_v18, %s2494_s22  ;;  %1636 = vst.msk [vmem:[#allocation3 + $0x8] sm:$0xff] %vm1634_vm10, %v1541_v8  ;;  %v1501_v8 = vld [vmem:[#allocation2 + $0x171] sm:$0xff] }
 0x188   : > { %1008 = vrot.lane.b32.xlu0 %v1497_v18, %s2491_s19  ;;  %v1677_v18 = vld [vmem:[#allocation2 + $0xaa] sm:$0xff] }
 0x189   : > { %v995_v54 = vpop.permute.xlu1 %994 }
 0x18a   : > { %1073 = vst.msk [vmem:[#allocation3 + $0x90] sm:$0xff] %vm1054_vm7, %v995_v54  ;;  %v1732_v14 = vpop.permute.xlu0 %1731 }
 0x18b   : > { %1775 = vrot.lane.b32.xlu1 %v1689_v61, %s2495_s25  ;;  %1828 = vst.msk [vmem:[#allocation3] sm:$0xff] %vm1827_vm11, %v1732_v14  ;;  %v1693_v14 = vld [vmem:[#allocation2 + $0x16a] sm:$0xff] }
 0x18c   : > { %1199 = vrot.lane.b32.xlu0 %v1689_v61, %s2492_s20 }
 0x18d   : > { %v1573_v9 = vpop.permute.xlu1 %1572 }
 0x18e   : > { %1652 = vst.msk [vmem:[#allocation3 + $0x88] sm:$0xff] %vm1634_vm10, %v1573_v9  ;;  %v997_v0 = vpop.permute.xlu0 %996 }
 0x18f   : > { %1167 = vrot.lane.b32.xlu1 %v1673_v60, %s2492_s20  ;;  %1074 = vst.msk [vmem:[#allocation3 + $0x98] sm:$0xff] %vm1054_vm7, %v997_v0 }
 0x190   : > { %1777 = vrot.lane.b32.xlu0 %v1690_v55, %s2495_s25 }
 0x191   : > { %v1764_v25 = vpop.permute.xlu1 %1763 }
 0x192   : > { %1844 = vst.msk [vmem:[#allocation3 + $0x80] sm:$0xff] %vm1827_vm11, %v1764_v25  ;;  %v1188_v62 = vpop.permute.xlu0 %1187  ;;  %v1860_v26 = vld [vmem:[#allocation3] sm:$0xff] }
 0x193   : > { %1745 = vrot.lane.b32.xlu1 %v1674_v24, %s2495_s25  ;;  %1266 = vst.msk [vmem:[#allocation3 + $0x90] sm:$0xff] %vm1247_vm8, %v1188_v62  ;;  %2404 = vmatprep.mubr.msk.f32.mxu0 %vm1897_vm12, %v1860_v26 }
 0x194   : > { %1201 = vrot.lane.b32.xlu0 %v1690_v55, %s2492_s20 }
 0x195   : > { %v1156_v27 = vpop.permute.xlu1 %1155 }
 0x196   : > { %1250 = vst.msk [vmem:[#allocation3 + $0x10] sm:$0xff] %vm1247_vm8, %v1156_v27  ;;  %v1766_v30 = vpop.permute.xlu0 %1765 }
 0x197   : > { %1169 = vrot.lane.b32.xlu1 %v1674_v24, %s2492_s20  ;;  %1845 = vst.msk [vmem:[#allocation3 + $0x88] sm:$0xff] %vm1827_vm11, %v1766_v30  ;;  %v1678_v24 = vld [vmem:[#allocation2 + $0xb2] sm:$0xff] }
 0x198   : > { %1393 = vrot.lane.b32.xlu0 %v2813_v19, %s2493_s21  ;;  %v1694_v30 = vld [vmem:[#allocation2 + $0x172] sm:$0xff] }
 0x199   : > { %v1734_v32 = vpop.permute.xlu1 %1733  ;;  %v1876_v39 = vld [vmem:[#allocation3 + $0x80] sm:$0xff] }
 0x19a   : > { %1829 = vst.msk [vmem:[#allocation3 + $0x8] sm:$0xff] %vm1827_vm11, %v1734_v32  ;;  %2428 = vmatprep.mubr.msk.f32.mxu1 %vm1897_vm12, %v1876_v39  ;;  %v1190_v40 = vpop.permute.xlu0 %1189  ;;  %v1293_v32 = vld [vmem:[#allocation2 + $0xc0] sm:$0xff] }
 0x19b   : > { %1361 = vrot.lane.b32.xlu1 %v1289_v31, %s2493_s21  ;;  %1267 = vst.msk [vmem:[#allocation3 + $0x98] sm:$0xff] %vm1247_vm8, %v1190_v40 }
 0x19c   : > { %1395 = vrot.lane.b32.xlu0 %v2819_v20, %s2493_s21  ;;  %v1483_v20 = vld [vmem:[#allocation2 + $0x99] sm:$0xff] }
 0x19d   : > { %v1158_v42 = vpop.permute.xlu1 %1157 }
 0x19e   : > { %1251 = vst.msk [vmem:[#allocation3 + $0x18] sm:$0xff] %vm1247_vm8, %v1158_v42  ;;  %v1382_v19 = vpop.permute.xlu0 %1381  ;;  %v1877_v44 = vld [vmem:[#allocation3 + $0x88] sm:$0xff]  ;;  %v1294_v42 = vld [vmem:[#allocation2 + $0xc8] sm:$0xff] }
 0x19f   : > { %1363 = vrot.lane.b32.xlu1 %v1290_v41, %s2493_s21  ;;  %1460 = vst.msk [vmem:[#allocation3 + $0x90] sm:$0xff] %vm1441_vm9, %v1382_v19  ;;  %2429 = vmatmul.mubr.msk.f32.vlgmr.msra.gmra.mxu1 %vm1897_vm12, %v1877_v44  ;;  %v1309_v19 = vld [vmem:[#allocation2 + $0x180] sm:$0xff] }
 0x1a0   : > { %1586 = vrot.lane.b32.xlu0 %v1498_v43, %s2494_s22 }
 0x1a1   : > { %v1350_v13 = vpop.permute.xlu1 %1349  ;;  %v1861_v56 = vld [vmem:[#allocation3 + $0x8] sm:$0xff] }
 0x1a2   : > { %1444 = vst.msk [vmem:[#allocation3 + $0x10] sm:$0xff] %vm1441_vm9, %v1350_v13  ;;  %2405 = vmatmul.mubr.msk.f32.vlgmr.msra.gmra.mxu0 %vm1897_vm12, %v1861_v56  ;;  %v1384_v45 = vpop.permute.xlu0 %1383 }
 0x1a3   : > { %1554 = vrot.lane.b32.xlu1 %v1482_v46, %s2494_s22  ;;  %1461 = vst.msk [vmem:[#allocation3 + $0x98] sm:$0xff] %vm1441_vm9, %v1384_v45  ;;  %v1486_v46 = vld [vmem:[#allocation2 + $0xc1] sm:$0xff] }
 0x1a4   : > { %1556 = vrot.lane.b32.xlu0 %v1483_v20, %s2494_s22  ;;  %v1310_v20 = vld [vmem:[#allocation2 + $0x188] sm:$0xff] }
 0x1a5   : > { %v1352_v11 = vpop.permute.xlu1 %1351 }
 0x1a6   : > { %1445 = vst.msk [vmem:[#allocation3 + $0x18] sm:$0xff] %vm1441_vm9, %v1352_v11  ;;  %v1575_v28 = vpop.permute.xlu0 %1574 }
 0x1a7   : > { %1010 = vrot.lane.b32.xlu1 %v1498_v43, %s2491_s19  ;;  %1653 = vst.msk [vmem:[#allocation3 + $0x90] sm:$0xff] %vm1634_vm10, %v1575_v28  ;;  %v1502_v28 = vld [vmem:[#allocation2 + $0x181] sm:$0xff] }
 0x1a8   : > { %1747 = vrot.lane.b32.xlu0 %v1675_v48, %s2495_s25 }
 0x1a9   : > { %v1543_v63 = vpop.permute.xlu1 %1542 }
 0x1aa   : > { %1637 = vst.msk [vmem:[#allocation3 + $0x10] sm:$0xff] %vm1634_vm10, %v1543_v63  ;;  %v1545_v12 = vpop.permute.xlu0 %1544  ;;  %v1487_v63 = vld [vmem:[#allocation2 + $0xc9] sm:$0xff] }
 0x1ab   : > { %1588 = vrot.lane.b32.xlu1 %v1499_v57, %s2494_s22  ;;  %1638 = vst.msk [vmem:[#allocation3 + $0x18] sm:$0xff] %vm1634_vm10, %v1545_v12 }
 0x1ac   : > { %1012 = vrot.lane.b32.xlu0 %v1499_v57, %s2491_s19 }
 0x1ad   : > { %v999_v6 = vpop.permute.xlu1 %998 }
 0x1ae   : > { %1075 = vst.msk [vmem:[#allocation3 + $0xa0] sm:$0xff] %vm1054_vm7, %v999_v6  ;;  %v1736_v2 = vpop.permute.xlu0 %1735  ;;  %v1679_v6 = vld [vmem:[#allocation2 + $0xc2] sm:$0xff] }
 0x1af   : > { %1779 = vrot.lane.b32.xlu1 %v1691_v58, %s2495_s25  ;;  %1830 = vst.msk [vmem:[#allocation3 + $0x10] sm:$0xff] %vm1827_vm11, %v1736_v2 }
 0x1b0   : > { %1203 = vrot.lane.b32.xlu0 %v1691_v58, %s2492_s20 }
 0x1b1   : > { %v1577_v50 = vpop.permute.xlu1 %1576 }
 0x1b2   : > { %1654 = vst.msk [vmem:[#allocation3 + $0x98] sm:$0xff] %vm1634_vm10, %v1577_v50  ;;  %v1001_v1 = vpop.permute.xlu0 %1000  ;;  %v1503_v50 = vld [vmem:[#allocation2 + $0x189] sm:$0xff] }
 0x1b3   : > { %1171 = vrot.lane.b32.xlu1 %v1675_v48, %s2492_s20  ;;  %1076 = vst.msk [vmem:[#allocation3 + $0xa8] sm:$0xff] %vm1054_vm7, %v1001_v1 }
 0x1b4   : > { %1781 = vrot.lane.b32.xlu0 %v1692_v7, %s2495_s25 }
 0x1b5   : > { %v1768_v4 = vpop.permute.xlu1 %1767 }
 0x1b6   : > { %1846 = vst.msk [vmem:[#allocation3 + $0x90] sm:$0xff] %vm1827_vm11, %v1768_v4  ;;  %v1192_v3 = vpop.permute.xlu0 %1191  ;;  %v1862_v10 = vld [vmem:[#allocation3 + $0x10] sm:$0xff] }
 0x1b7   : > { %1749 = vrot.lane.b32.xlu1 %v1676_v52, %s2495_s25  ;;  %1268 = vst.msk [vmem:[#allocation3 + $0xa0] sm:$0xff] %vm1247_vm8, %v1192_v3  ;;  %2407 = vmatprep.mubr.msk.f32.mxu0 %vm1897_vm12, %v1862_v10 }
 0x1b8   : > { %1205 = vrot.lane.b32.xlu0 %v1692_v7, %s2492_s20 }
 0x1b9   : > { %v1160_v47 = vpop.permute.xlu1 %1159 }
 0x1ba   : > { %1252 = vst.msk [vmem:[#allocation3 + $0x20] sm:$0xff] %vm1247_vm8, %v1160_v47  ;;  %v1770_v35 = vpop.permute.xlu0 %1769  ;;  %v1680_v47 = vld [vmem:[#allocation2 + $0xca] sm:$0xff] }
 0x1bb   : > { %1173 = vrot.lane.b32.xlu1 %v1676_v52, %s2492_s20  ;;  %1847 = vst.msk [vmem:[#allocation3 + $0x98] sm:$0xff] %vm1827_vm11, %v1770_v35  ;;  %v1695_v52 = vld [vmem:[#allocation2 + $0x182] sm:$0xff] }
 0x1bc   : > { %1397 = vrot.lane.b32.xlu0 %v1307_v5, %s2493_s21 }
 0x1bd   : > { %v1738_v49 = vpop.permute.xlu1 %1737  ;;  %v1878_v37 = vld [vmem:[#allocation3 + $0x90] sm:$0xff] }
 0x1be   : > { %1831 = vst.msk [vmem:[#allocation3 + $0x18] sm:$0xff] %vm1827_vm11, %v1738_v49  ;;  %2431 = vmatprep.mubr.msk.f32.mxu1 %vm1897_vm12, %v1878_v37  ;;  %v1194_v36 = vpop.permute.xlu0 %1193  ;;  %v1696_v37 = vld [vmem:[#allocation2 + $0x18a] sm:$0xff] }
 0x1bf   : > { %1365 = vrot.lane.b32.xlu1 %v1291_v38, %s2493_s21  ;;  %1269 = vst.msk [vmem:[#allocation3 + $0xa8] sm:$0xff] %vm1247_vm8, %v1194_v36 }
 0x1c0   : > { %1399 = vrot.lane.b32.xlu0 %v1308_v17, %s2493_s21 }
 0x1c1   : > { %v1162_v21 = vpop.permute.xlu1 %1161 }
 0x1c2   : > { %1253 = vst.msk [vmem:[#allocation3 + $0x28] sm:$0xff] %vm1247_vm8, %v1162_v21  ;;  %v1386_v15 = vpop.permute.xlu0 %1385  ;;  %v1879_v53 = vld [vmem:[#allocation3 + $0x98] sm:$0xff] }
 0x1c3   : > { %1367 = vrot.lane.b32.xlu1 %v1292_v22, %s2493_s21  ;;  %1462 = vst.msk [vmem:[#allocation3 + $0xa0] sm:$0xff] %vm1441_vm9, %v1386_v15  ;;  %2432 = vmatmul.mubr.msk.f32.gmra.mxu1 %vm1897_vm12, %v1879_v53  ;;  %v1295_v22 = vld [vmem:[#allocation2 + $0xd8] sm:$0xff]  ;;  %v1296_v15 = vld [vmem:[#allocation2 + $0xe0] sm:$0xff] }
 0x1c4   : > { %1590 = vrot.lane.b32.xlu0 %v1500_v51, %s2494_s22 }
 0x1c5   : > { %v1354_v59 = vpop.permute.xlu1 %1353  ;;  %v1863_v16 = vld [vmem:[#allocation3 + $0x18] sm:$0xff] }
 0x1c6   : > { %1446 = vst.msk [vmem:[#allocation3 + $0x20] sm:$0xff] %vm1441_vm9, %v1354_v59  ;;  %2408 = vmatmul.mubr.msk.f32.gmra.mxu0 %vm1897_vm12, %v1863_v16  ;;  %v1388_v60 = vpop.permute.xlu0 %1387  ;;  %v1311_v59 = vld [vmem:[#allocation2 + $0x198] sm:$0xff] }
 0x1c7   : > { %1558 = vrot.lane.b32.xlu1 %v1484_v29, %s2494_s22  ;;  %1463 = vst.msk [vmem:[#allocation3 + $0xa8] sm:$0xff] %vm1441_vm9, %v1388_v60  ;;  %v1488_v60 = vld [vmem:[#allocation2 + $0xd9] sm:$0xff] }
 0x1c8   : > { %1560 = vrot.lane.b32.xlu0 %v1485_v34, %s2494_s22 }
 0x1c9   : > { %v1356_v33 = vpop.permute.xlu1 %1355 }
 0x1ca   : > { %1447 = vst.msk [vmem:[#allocation3 + $0x28] sm:$0xff] %vm1441_vm9, %v1356_v33  ;;  %v1579_v23 = vpop.permute.xlu0 %1578 }
 0x1cb   : > { %1014 = vrot.lane.b32.xlu1 %v1500_v51, %s2491_s19  ;;  %1655 = vst.msk [vmem:[#allocation3 + $0xa0] sm:$0xff] %vm1634_vm10, %v1579_v23 }
 0x1cc   : > { %1751 = vrot.lane.b32.xlu0 %v1677_v18, %s2495_s25 }
 0x1cd   : > { %v1547_v61 = vpop.permute.xlu1 %1546 }
 0x1ce   : > { %1639 = vst.msk [vmem:[#allocation3 + $0x20] sm:$0xff] %vm1634_vm10, %v1547_v61  ;;  %v1549_v54 = vpop.permute.xlu0 %1548 }
 0x1cf   : > { %1592 = vrot.lane.b32.xlu1 %v1501_v8, %s2494_s22  ;;  %1640 = vst.msk [vmem:[#allocation3 + $0x28] sm:$0xff] %vm1634_vm10, %v1549_v54  ;;  %v1504_v54 = vld [vmem:[#allocation2 + $0x199] sm:$0xff] }
 0x1d0   : > { %984 = vrot.lane.b32.xlu0 %v1485_v34, %s2491_s19 }
 0x1d1   : > { %v1003_v9 = vpop.permute.xlu1 %1002 }
 0x1d2   : > { %1077 = vst.msk [vmem:[#allocation3 + $0xb0] sm:$0xff] %vm1054_vm7, %v1003_v9  ;;  %v1740_v55 = vpop.permute.xlu0 %1739  ;;  %v1681_v9 = vld [vmem:[#allocation2 + $0xda] sm:$0xff] }
 0x1d3   : > { %1783 = vrot.lane.b32.xlu1 %v1693_v14, %s2495_s25  ;;  %1832 = vst.msk [vmem:[#allocation3 + $0x20] sm:$0xff] %vm1827_vm11, %v1740_v55 }
 0x1d4   : > { %1175 = vrot.lane.b32.xlu0 %v1677_v18, %s2492_s20  ;;  %v1312_v18 = vld [vmem:[#allocation2 + $0x1a0] sm:$0xff] }
 0x1d5   : > { %v1581_v0 = vpop.permute.xlu1 %1580 }
 0x1d6   : > { %1656 = vst.msk [vmem:[#allocation3 + $0xa8] sm:$0xff] %vm1634_vm10, %v1581_v0  ;;  %v1005_v25 = vpop.permute.xlu0 %1004  ;;  %v1505_v0 = vld [vmem:[#allocation2 + $0x1a1] sm:$0xff] }
 0x1d7   : > { %1016 = vrot.lane.b32.xlu1 %v1501_v8, %s2491_s19  ;;  %1078 = vst.msk [vmem:[#allocation3 + $0xb8] sm:$0xff] %vm1054_vm7, %v1005_v25  ;;  %v1489_v8 = vld [vmem:[#allocation2 + $0xe1] sm:$0xff] }
 0x1d8   : > { %1753 = vrot.lane.b32.xlu0 %v1678_v24, %s2495_s25  ;;  %v1682_v25 = vld [vmem:[#allocation2 + $0xe2] sm:$0xff] }
 0x1d9   : > { %v1772_v62 = vpop.permute.xlu1 %1771 }
 0x1da   : > { %1848 = vst.msk [vmem:[#allocation3 + $0xa0] sm:$0xff] %vm1827_vm11, %v1772_v62  ;;  %v1196_v26 = vpop.permute.xlu0 %1195  ;;  %v1864_v27 = vld [vmem:[#allocation3 + $0x20] sm:$0xff] }
 0x1db   : > { %1207 = vrot.lane.b32.xlu1 %v1693_v14, %s2492_s20  ;;  %1270 = vst.msk [vmem:[#allocation3 + $0xb0] sm:$0xff] %vm1247_vm8, %v1196_v26  ;;  %2410 = vmatprep.mubr.msk.f32.mxu0 %vm1897_vm12, %v1864_v27  ;;  %v1697_v26 = vld [vmem:[#allocation2 + $0x19a] sm:$0xff] }
 0x1dc   : > { %1177 = vrot.lane.b32.xlu0 %v1678_v24, %s2492_s20 }
 0x1dd   : > { %v1164_v31 = vpop.permute.xlu1 %1163 }
 0x1de   : > { %1254 = vst.msk [vmem:[#allocation3 + $0x30] sm:$0xff] %vm1247_vm8, %v1164_v31  ;;  %v1774_v39 = vpop.permute.xlu0 %1773  ;;  %v1698_v31 = vld [vmem:[#allocation2 + $0x1a2] sm:$0xff] }
 0x1df   : > { %1785 = vrot.lane.b32.xlu1 %v1694_v30, %s2495_s25  ;;  %1849 = vst.msk [vmem:[#allocation3 + $0xa8] sm:$0xff] %vm1827_vm11, %v1774_v39 }
 0x1e0   : > { %1369 = vrot.lane.b32.xlu0 %v1293_v32, %s2493_s21 }
 0x1e1   : > { %v1742_v40 = vpop.permute.xlu1 %1741  ;;  %v1880_v41 = vld [vmem:[#allocation3 + $0xa0] sm:$0xff] }
 0x1e2   : > { %1833 = vst.msk [vmem:[#allocation3 + $0x28] sm:$0xff] %vm1827_vm11, %v1742_v40  ;;  %2434 = vmatprep.mubr.msk.f32.mxu1 %vm1897_vm12, %v1880_v41  ;;  %v1198_v43 = vpop.permute.xlu0 %1197 }
 0x1e3   : > { %1209 = vrot.lane.b32.xlu1 %v1694_v30, %s2492_s20  ;;  %1271 = vst.msk [vmem:[#allocation3 + $0xb8] sm:$0xff] %vm1247_vm8, %v1198_v43 }
 0x1e4   : > { %1371 = vrot.lane.b32.xlu0 %v1294_v42, %s2493_s21 }
 0x1e5   : > { %v1166_v44 = vpop.permute.xlu1 %1165 }
 0x1e6   : > { %1255 = vst.msk [vmem:[#allocation3 + $0x38] sm:$0xff] %vm1247_vm8, %v1166_v44  ;;  %v1390_v13 = vpop.permute.xlu0 %1389  ;;  %v1881_v56 = vld [vmem:[#allocation3 + $0xa8] sm:$0xff] }
 0x1e7   : > { %1401 = vrot.lane.b32.xlu1 %v1309_v19, %s2493_s21  ;;  %1464 = vst.msk [vmem:[#allocation3 + $0xb0] sm:$0xff] %vm1441_vm9, %v1390_v13  ;;  %2435 = vmatmul.mubr.msk.f32.gmra.mxu1 %vm1897_vm12, %v1881_v56 }
 0x1e8   : > { %1562 = vrot.lane.b32.xlu0 %v1486_v46, %s2494_s22 }
 0x1e9   : > { %v1358_v45 = vpop.permute.xlu1 %1357  ;;  %v1865_v11 = vld [vmem:[#allocation3 + $0x28] sm:$0xff] }
 0x1ea   : > { %1448 = vst.msk [vmem:[#allocation3 + $0x30] sm:$0xff] %vm1441_vm9, %v1358_v45  ;;  %2411 = vmatmul.mubr.msk.f32.gmra.mxu0 %vm1897_vm12, %v1865_v11  ;;  %v1392_v48 = vpop.permute.xlu0 %1391 }
 0x1eb   : > { %1403 = vrot.lane.b32.xlu1 %v1310_v20, %s2493_s21  ;;  %1465 = vst.msk [vmem:[#allocation3 + $0xb8] sm:$0xff] %vm1441_vm9, %v1392_v48 }
 0x1ec   : > { %986 = vrot.lane.b32.xlu0 %v1486_v46, %s2491_s19 }
 0x1ed   : > { %v1360_v57 = vpop.permute.xlu1 %1359 }
 0x1ee   : > { %1449 = vst.msk [vmem:[#allocation3 + $0x38] sm:$0xff] %vm1441_vm9, %v1360_v57  ;;  %v1583_v12 = vpop.permute.xlu0 %1582 }
 0x1ef   : > { %1594 = vrot.lane.b32.xlu1 %v1502_v28, %s2494_s22  ;;  %1657 = vst.msk [vmem:[#allocation3 + $0xb0] sm:$0xff] %vm1634_vm10, %v1583_v12 }
 0x1f0   : > { %1564 = vrot.lane.b32.xlu0 %v1487_v63, %s2494_s22 }
 0x1f1   : > { %v1551_v58 = vpop.permute.xlu1 %1550 }
 0x1f2   : > { %1641 = vst.msk [vmem:[#allocation3 + $0x30] sm:$0xff] %vm1634_vm10, %v1551_v58  ;;  %v1553_v2 = vpop.permute.xlu0 %1552 }
 0x1f3   : > { %1018 = vrot.lane.b32.xlu1 %v1502_v28, %s2491_s19  ;;  %1642 = vst.msk [vmem:[#allocation3 + $0x38] sm:$0xff] %vm1634_vm10, %v1553_v2 }
 0x1f4   : > { %1755 = vrot.lane.b32.xlu0 %v1679_v6, %s2495_s25 }
 0x1f5   : > { %v1007_v7 = vpop.permute.xlu1 %1006 }
 0x1f6   : > { %1079 = vst.msk [vmem:[#allocation3 + $0xc0] sm:$0xff] %vm1054_vm7, %v1007_v7  ;;  %v1744_v1 = vpop.permute.xlu0 %1743 }
 0x1f7   : > { %1596 = vrot.lane.b32.xlu1 %v1503_v50, %s2494_s22  ;;  %1834 = vst.msk [vmem:[#allocation3 + $0x30] sm:$0xff] %vm1827_vm11, %v1744_v1 }
 0x1f8   : > { %988 = vrot.lane.b32.xlu0 %v1487_v63, %s2491_s19 }
 0x1f9   : > { %v1585_v4 = vpop.permute.xlu1 %1584 }
 0x1fa   : > { %1658 = vst.msk [vmem:[#allocation3 + $0xb8] sm:$0xff] %vm1634_vm10, %v1585_v4  ;;  %v1009_v3 = vpop.permute.xlu0 %1008 }
 0x1fb   : > { %1787 = vrot.lane.b32.xlu1 %v1695_v52, %s2495_s25  ;;  %1080 = vst.msk [vmem:[#allocation3 + $0xc8] sm:$0xff] %vm1054_vm7, %v1009_v3 }
 0x1fc   : > { %1179 = vrot.lane.b32.xlu0 %v1679_v6, %s2492_s20 }
 0x1fd   : > { %v1776_v10 = vpop.permute.xlu1 %1775 }
 0x1fe   : > { %1850 = vst.msk [vmem:[#allocation3 + $0xb0] sm:$0xff] %vm1827_vm11, %v1776_v10  ;;  %v1200_v5 = vpop.permute.xlu0 %1199  ;;  %v1866_v35 = vld [vmem:[#allocation3 + $0x30] sm:$0xff] }
 0x1ff   : > { %1020 = vrot.lane.b32.xlu1 %v1503_v50, %s2491_s19  ;;  %1272 = vst.msk [vmem:[#allocation3 + $0xc0] sm:$0xff] %vm1247_vm8, %v1200_v5  ;;  %2413 = vmatprep.mubr.msk.f32.mxu0 %vm1897_vm12, %v1866_v35 }
 0x200   : > { %1757 = vrot.lane.b32.xlu0 %v1680_v47, %s2495_s25 }
 0x201   : > { %v1168_v38 = vpop.permute.xlu1 %1167 }
 0x202   : > { %1256 = vst.msk [vmem:[#allocation3 + $0x40] sm:$0xff] %vm1247_vm8, %v1168_v38  ;;  %v1778_v49 = vpop.permute.xlu0 %1777 }
 0x203   : > { %1211 = vrot.lane.b32.xlu1 %v1695_v52, %s2492_s20  ;;  %1851 = vst.msk [vmem:[#allocation3 + $0xb8] sm:$0xff] %vm1827_vm11, %v1778_v49 }
 0x204   : > { %1181 = vrot.lane.b32.xlu0 %v1680_v47, %s2492_s20 }
 0x205   : > { %v1746_v17 = vpop.permute.xlu1 %1745  ;;  %v1882_v36 = vld [vmem:[#allocation3 + $0xb0] sm:$0xff] }
 0x206   : > { %1835 = vst.msk [vmem:[#allocation3 + $0x38] sm:$0xff] %vm1827_vm11, %v1746_v17  ;;  %2437 = vmatprep.mubr.msk.f32.mxu1 %vm1897_vm12, %v1882_v36  ;;  %v1202_v21 = vpop.permute.xlu0 %1201 }
 0x207   : > { %1789 = vrot.lane.b32.xlu1 %v1696_v37, %s2495_s25  ;;  %1273 = vst.msk [vmem:[#allocation3 + $0xc8] sm:$0xff] %vm1247_vm8, %v1202_v21 }
 0x208   : > { %1373 = vrot.lane.b32.xlu0 %v1295_v22, %s2493_s21 }
 0x209   : > { %v1170_v51 = vpop.permute.xlu1 %1169 }
 0x20a   : > { %1257 = vst.msk [vmem:[#allocation3 + $0x48] sm:$0xff] %vm1247_vm8, %v1170_v51  ;;  %v1394_v53 = vpop.permute.xlu0 %1393  ;;  %v1883_v29 = vld [vmem:[#allocation3 + $0xb8] sm:$0xff] }
 0x20b   : > { %1213 = vrot.lane.b32.xlu1 %v1696_v37, %s2492_s20  ;;  %1466 = vst.msk [vmem:[#allocation3 + $0xc0] sm:$0xff] %vm1441_vm9, %v1394_v53  ;;  %2438 = vmatmul.mubr.msk.f32.gmra.mxu1 %vm1897_vm12, %v1883_v29 }
 0x20c   : > { %1375 = vrot.lane.b32.xlu0 %v1296_v15, %s2493_s21 }
 0x20d   : > { %v1362_v16 = vpop.permute.xlu1 %1361  ;;  %v1867_v34 = vld [vmem:[#allocation3 + $0x38] sm:$0xff] }
 0x20e   : > { %1450 = vst.msk [vmem:[#allocation3 + $0x40] sm:$0xff] %vm1441_vm9, %v1362_v16  ;;  %2414 = vmatmul.mubr.msk.f32.gmra.mxu0 %vm1897_vm12, %v1867_v34  ;;  %v1396_v33 = vpop.permute.xlu0 %1395 }
 0x20f   : > { %1405 = vrot.lane.b32.xlu1 %v1311_v59, %s2493_s21  ;;  %1467 = vst.msk [vmem:[#allocation3 + $0xc8] sm:$0xff] %vm1441_vm9, %v1396_v33 }
 0x210   : > { %1566 = vrot.lane.b32.xlu0 %v1488_v60, %s2494_s22 }
 0x211   : > { %v1364_v23 = vpop.permute.xlu1 %1363 }
 0x212   : > { %1451 = vst.msk [vmem:[#allocation3 + $0x48] sm:$0xff] %vm1441_vm9, %v1364_v23  ;;  %v1587_v61 = vpop.permute.xlu0 %1586 }
 0x213   : > { %1407 = vrot.lane.b32.xlu1 %v1312_v18, %s2493_s21  ;;  %1659 = vst.msk [vmem:[#allocation3 + $0xc0] sm:$0xff] %vm1634_vm10, %v1587_v61 }
 0x214   : > { %1568 = vrot.lane.b32.xlu0 %v1489_v8, %s2494_s22 }
 0x215   : > { %v1555_v14 = vpop.permute.xlu1 %1554 }
 0x216   : > { %1643 = vst.msk [vmem:[#allocation3 + $0x40] sm:$0xff] %vm1634_vm10, %v1555_v14  ;;  %v1557_v55 = vpop.permute.xlu0 %1556 }
 0x217   : > { %1598 = vrot.lane.b32.xlu1 %v1504_v54, %s2494_s22  ;;  %1644 = vst.msk [vmem:[#allocation3 + $0x48] sm:$0xff] %vm1634_vm10, %v1557_v55 }
 0x218   : > { %1759 = vrot.lane.b32.xlu0 %v1681_v9, %s2495_s25 }
 0x219   : > { %v1011_v24 = vpop.permute.xlu1 %1010 }
 0x21a   : > { %1081 = vst.msk [vmem:[#allocation3 + $0xd0] sm:$0xff] %vm1054_vm7, %v1011_v24  ;;  %v1748_v62 = vpop.permute.xlu0 %1747 }
 0x21b   : > { %1600 = vrot.lane.b32.xlu1 %v1505_v0, %s2494_s22  ;;  %1836 = vst.msk [vmem:[#allocation3 + $0x40] sm:$0xff] %vm1827_vm11, %v1748_v62 }
 0x21c   : > { %1761 = vrot.lane.b32.xlu0 %v1682_v25, %s2495_s25 }
 0x21d   : > { %v1589_v27 = vpop.permute.xlu1 %1588 }
 0x21e   : > { %1660 = vst.msk [vmem:[#allocation3 + $0xc8] sm:$0xff] %vm1634_vm10, %v1589_v27  ;;  %v1013_v30 = vpop.permute.xlu0 %1012 }
 0x21f   : > { %1791 = vrot.lane.b32.xlu1 %v1697_v26, %s2495_s25  ;;  %1082 = vst.msk [vmem:[#allocation3 + $0xd8] sm:$0xff] %vm1054_vm7, %v1013_v30 }
 0x221   : > { %v1780_v32 = vpop.permute.xlu1 %1779 }
 0x222   : > { %1852 = vst.msk [vmem:[#allocation3 + $0xc0] sm:$0xff] %vm1827_vm11, %v1780_v32  ;;  %v1204_v39 = vpop.permute.xlu0 %1203  ;;  %v1868_v40 = vld [vmem:[#allocation3 + $0x40] sm:$0xff] }
 0x223   : > { %1793 = vrot.lane.b32.xlu1 %v1698_v31, %s2495_s25  ;;  %1274 = vst.msk [vmem:[#allocation3 + $0xd0] sm:$0xff] %vm1247_vm8, %v1204_v39  ;;  %2416 = vmatprep.mubr.msk.f32.mxu0 %vm1897_vm12, %v1868_v40 }
 0x225   : > { %v1172_v41 = vpop.permute.xlu1 %1171 }
 0x226   : > { %1258 = vst.msk [vmem:[#allocation3 + $0x50] sm:$0xff] %vm1247_vm8, %v1172_v41  ;;  %v1782_v42 = vpop.permute.xlu0 %1781 }
 0x227   : > { %1853 = vst.msk [vmem:[#allocation3 + $0xc8] sm:$0xff] %vm1827_vm11, %v1782_v42 }
 0x229   : > { %v1750_v43 = vpop.permute.xlu1 %1749  ;;  %v1884_v19 = vld [vmem:[#allocation3 + $0xc0] sm:$0xff] }
 0x22a   : > { %1837 = vst.msk [vmem:[#allocation3 + $0x48] sm:$0xff] %vm1827_vm11, %v1750_v43  ;;  %2440 = vmatprep.mubr.msk.f32.mxu1 %vm1897_vm12, %v1884_v19  ;;  %v1206_v44 = vpop.permute.xlu0 %1205 }
 0x22b   : > { %1275 = vst.msk [vmem:[#allocation3 + $0xd8] sm:$0xff] %vm1247_vm8, %v1206_v44 }
 0x22d   : > { %v1174_v46 = vpop.permute.xlu1 %1173 }
 0x22e   : > { %1259 = vst.msk [vmem:[#allocation3 + $0x58] sm:$0xff] %vm1247_vm8, %v1174_v46  ;;  %v1398_v13 = vpop.permute.xlu0 %1397  ;;  %v1885_v56 = vld [vmem:[#allocation3 + $0xc8] sm:$0xff] }
 0x22f   : > { %1468 = vst.msk [vmem:[#allocation3 + $0xd0] sm:$0xff] %vm1441_vm9, %v1398_v13  ;;  %2441 = vmatmul.mubr.msk.f32.gmra.mxu1 %vm1897_vm12, %v1885_v56 }
 0x231   : > { %v1366_v20 = vpop.permute.xlu1 %1365  ;;  %v1869_v45 = vld [vmem:[#allocation3 + $0x48] sm:$0xff] }
 0x232   : > { %1452 = vst.msk [vmem:[#allocation3 + $0x50] sm:$0xff] %vm1441_vm9, %v1366_v20  ;;  %2417 = vmatmul.mubr.msk.f32.gmra.mxu0 %vm1897_vm12, %v1869_v45  ;;  %v1400_v11 = vpop.permute.xlu0 %1399 }
 0x233   : > { %1469 = vst.msk [vmem:[#allocation3 + $0xd8] sm:$0xff] %vm1441_vm9, %v1400_v11 }
 0x235   : > { %v1368_v48 = vpop.permute.xlu1 %1367 }
 0x236   : > { %1453 = vst.msk [vmem:[#allocation3 + $0x58] sm:$0xff] %vm1441_vm9, %v1368_v48  ;;  %v1591_v28 = vpop.permute.xlu0 %1590 }
 0x237   : > { %1661 = vst.msk [vmem:[#allocation3 + $0xd0] sm:$0xff] %vm1634_vm10, %v1591_v28 }
 0x239   : > { %v1559_v57 = vpop.permute.xlu1 %1558 }
 0x23a   : > { %1645 = vst.msk [vmem:[#allocation3 + $0x50] sm:$0xff] %vm1634_vm10, %v1559_v57  ;;  %v1561_v63 = vpop.permute.xlu0 %1560 }
 0x23b   : > { %1646 = vst.msk [vmem:[#allocation3 + $0x58] sm:$0xff] %vm1634_vm10, %v1561_v63 }
 0x23d   : > { %v1015_v12 = vpop.permute.xlu1 %1014 }
 0x23e   : > { %1083 = vst.msk [vmem:[#allocation3 + $0xe0] sm:$0xff] %vm1054_vm7, %v1015_v12  ;;  %v1752_v58 = vpop.permute.xlu0 %1751 }
 0x23f   : > { %1838 = vst.msk [vmem:[#allocation3 + $0x50] sm:$0xff] %vm1827_vm11, %v1752_v58 }
 0x241   : > { %v1593_v6 = vpop.permute.xlu1 %1592 }
 0x242   : > { %1662 = vst.msk [vmem:[#allocation3 + $0xd8] sm:$0xff] %vm1634_vm10, %v1593_v6  ;;  %v985_v2 = vpop.permute.xlu0 %984 }
 0x243   : > { %1068 = vst.msk [vmem:[#allocation3 + $0x68] sm:$0xff] %vm1054_vm7, %v985_v2 }
 0x245   : > { %v1784_v50 = vpop.permute.xlu1 %1783 }
 0x246   : > { %1854 = vst.msk [vmem:[#allocation3 + $0xd0] sm:$0xff] %vm1827_vm11, %v1784_v50  ;;  %v1176_v7 = vpop.permute.xlu0 %1175  ;;  %v1870_v1 = vld [vmem:[#allocation3 + $0x50] sm:$0xff] }
 0x247   : > { %1260 = vst.msk [vmem:[#allocation3 + $0x60] sm:$0xff] %vm1247_vm8, %v1176_v7  ;;  %2419 = vmatprep.mubr.msk.f32.mxu0 %vm1897_vm12, %v1870_v1 }
 0x249   : > { %v1017_v52 = vpop.permute.xlu1 %1016 }
 0x24a   : > { %1084 = vst.msk [vmem:[#allocation3 + $0xe8] sm:$0xff] %vm1054_vm7, %v1017_v52  ;;  %v1754_v4 = vpop.permute.xlu0 %1753 }
 0x24b   : > { %1839 = vst.msk [vmem:[#allocation3 + $0x58] sm:$0xff] %vm1827_vm11, %v1754_v4 }
 0x24d   : > { %v1208_v3 = vpop.permute.xlu1 %1207  ;;  %v1886_v10 = vld [vmem:[#allocation3 + $0xd0] sm:$0xff] }
 0x24e   : > { %1276 = vst.msk [vmem:[#allocation3 + $0xe0] sm:$0xff] %vm1247_vm8, %v1208_v3  ;;  %2443 = vmatprep.mubr.msk.f32.mxu1 %vm1897_vm12, %v1886_v10  ;;  %v1178_v47 = vpop.permute.xlu0 %1177 }
 0x24f   : > { %1261 = vst.msk [vmem:[#allocation3 + $0x68] sm:$0xff] %vm1247_vm8, %v1178_v47 }
 0x251   : > { %v1786_v5 = vpop.permute.xlu1 %1785 }
 0x252   : > { %1855 = vst.msk [vmem:[#allocation3 + $0xd8] sm:$0xff] %vm1827_vm11, %v1786_v5  ;;  %v1370_v35 = vpop.permute.xlu0 %1369  ;;  %v1871_v38 = vld [vmem:[#allocation3 + $0x58] sm:$0xff] }
 0x253   : > { %1454 = vst.msk [vmem:[#allocation3 + $0x60] sm:$0xff] %vm1441_vm9, %v1370_v35  ;;  %2420 = vmatmul.mubr.msk.f32.gmra.mxu0 %vm1897_vm12, %v1871_v38 }
 0x255   : > { %v1210_v49 = vpop.permute.xlu1 %1209 }
 0x256   : > { %1277 = vst.msk [vmem:[#allocation3 + $0xe8] sm:$0xff] %vm1247_vm8, %v1210_v49  ;;  %v1372_v37 = vpop.permute.xlu0 %1371 }
 0x257   : > { %1455 = vst.msk [vmem:[#allocation3 + $0x68] sm:$0xff] %vm1441_vm9, %v1372_v37 }
 0x259   : > { %v1402_v17 = vpop.permute.xlu1 %1401  ;;  %v1887_v36 = vld [vmem:[#allocation3 + $0xd8] sm:$0xff] }
 0x25a   : > { %1470 = vst.msk [vmem:[#allocation3 + $0xe0] sm:$0xff] %vm1441_vm9, %v1402_v17  ;;  %2444 = vmatmul.mubr.msk.f32.gmra.mxu1 %vm1897_vm12, %v1887_v36  ;;  %v1563_v22 = vpop.permute.xlu0 %1562 }
 0x25b   : > { %1647 = vst.msk [vmem:[#allocation3 + $0x60] sm:$0xff] %vm1634_vm10, %v1563_v22 }
 0x25d   : > { %v1404_v21 = vpop.permute.xlu1 %1403 }
 0x25e   : > { %1471 = vst.msk [vmem:[#allocation3 + $0xe8] sm:$0xff] %vm1441_vm9, %v1404_v21  ;;  %v987_v51 = vpop.permute.xlu0 %986 }
 0x25f   : > { %1069 = vst.msk [vmem:[#allocation3 + $0x70] sm:$0xff] %vm1054_vm7, %v987_v51  ;;  %v2430_v15 = vpop.f32.mrf.mxu1 }
 0x260   : > { %2241 = vst.msk [vmem:[%s3473_s8 + $0x88] sm:$0xff] %vm2223_vm13, %v2430_v15 }
 0x261   : > { %v1595_v53 = vpop.permute.xlu1 %1594  ;;  %v2144_v59 = vpop.f32.mrf.mxu1 }
 0x262   : > { %1663 = vst.msk [vmem:[#allocation3 + $0xe0] sm:$0xff] %vm1634_vm10, %v1595_v53  ;;  %v2406_v29 = vpop.f32.mrf.mxu0  ;;  %v1565_v16 = vpop.permute.xlu0 %1564 }
 0x263   : > { %2225 = vst.msk [vmem:[%s3473_s8 + $0x8] sm:$0xff] %vm2223_vm13, %v2406_v29  ;;  %2240 = vst.msk [vmem:[%s3473_s8 + $0x80] sm:$0xff] %vm2223_vm13, %v2144_v59 }
 0x264   : > { %v2064_v34 = vpop.f32.mrf.mxu0  ;;  %1648 = vst.msk [vmem:[#allocation3 + $0x68] sm:$0xff] %vm1634_vm10, %v1565_v16 }
 0x265   : > { %2224 = vst.msk [vmem:[%s3473_s8] sm:$0xff] %vm2223_vm13, %v2064_v34  ;;  %v1019_v60 = vpop.permute.xlu1 %1018 }
 0x266   : > { %1085 = vst.msk [vmem:[#allocation3 + $0xf0] sm:$0xff] %vm1054_vm7, %v1019_v60  ;;  %v1756_v33 = vpop.permute.xlu0 %1755 }
 0x267   : > { %1840 = vst.msk [vmem:[#allocation3 + $0x60] sm:$0xff] %vm1827_vm11, %v1756_v33 }
 0x269   : > { %v1597_v18 = vpop.permute.xlu1 %1596 }
 0x26a   : > { %1664 = vst.msk [vmem:[#allocation3 + $0xe8] sm:$0xff] %vm1634_vm10, %v1597_v18  ;;  %v989_v23 = vpop.permute.xlu0 %988 }
 0x26b   : > { %1070 = vst.msk [vmem:[#allocation3 + $0x78] sm:$0xff] %vm1054_vm7, %v989_v23 }
 0x26d   : > { %v1788_v8 = vpop.permute.xlu1 %1787 }
 0x26e   : > { %1856 = vst.msk [vmem:[#allocation3 + $0xe0] sm:$0xff] %vm1827_vm11, %v1788_v8  ;;  %v1180_v61 = vpop.permute.xlu0 %1179  ;;  %v1872_v54 = vld [vmem:[#allocation3 + $0x60] sm:$0xff] }
 0x26f   : > { %1262 = vst.msk [vmem:[#allocation3 + $0x70] sm:$0xff] %vm1247_vm8, %v1180_v61  ;;  %2422 = vmatprep.mubr.msk.f32.mxu0 %vm1897_vm12, %v1872_v54 }
 0x271   : > { %v1021_v14 = vpop.permute.xlu1 %1020 }
 0x272   : > { %1086 = vst.msk [vmem:[#allocation3 + $0xf8] sm:$0xff] %vm1054_vm7, %v1021_v14  ;;  %v1758_v9 = vpop.permute.xlu0 %1757 }
 0x273   : > { %1841 = vst.msk [vmem:[#allocation3 + $0x68] sm:$0xff] %vm1827_vm11, %v1758_v9 }
 0x275   : > { %v1212_v55 = vpop.permute.xlu1 %1211  ;;  %v1888_v0 = vld [vmem:[#allocation3 + $0xe0] sm:$0xff] }
 0x276   : > { %1278 = vst.msk [vmem:[#allocation3 + $0xf0] sm:$0xff] %vm1247_vm8, %v1212_v55  ;;  %2446 = vmatprep.mubr.msk.f32.mxu1 %vm1897_vm12, %v1888_v0  ;;  %v1182_v24 = vpop.permute.xlu0 %1181 }
 0x277   : > { %1263 = vst.msk [vmem:[#allocation3 + $0x78] sm:$0xff] %vm1247_vm8, %v1182_v24 }
 0x279   : > { %v1790_v25 = vpop.permute.xlu1 %1789 }
 0x27a   : > { %1857 = vst.msk [vmem:[#allocation3 + $0xe8] sm:$0xff] %vm1827_vm11, %v1790_v25  ;;  %v1374_v62 = vpop.permute.xlu0 %1373  ;;  %v1873_v26 = vld [vmem:[#allocation3 + $0x68] sm:$0xff] }
 0x27b   : > { %1456 = vst.msk [vmem:[#allocation3 + $0x70] sm:$0xff] %vm1441_vm9, %v1374_v62  ;;  %2423 = vmatmul.mubr.msk.f32.gmra.mxu0 %vm1897_vm12, %v1873_v26 }
 0x27d   : > { %v1214_v27 = vpop.permute.xlu1 %1213 }
 0x27e   : > { %1279 = vst.msk [vmem:[#allocation3 + $0xf8] sm:$0xff] %vm1247_vm8, %v1214_v27  ;;  %v1376_v30 = vpop.permute.xlu0 %1375 }
 0x27f   : > { %1457 = vst.msk [vmem:[#allocation3 + $0x78] sm:$0xff] %vm1441_vm9, %v1376_v30 }
 0x281   : > { %v1406_v31 = vpop.permute.xlu1 %1405  ;;  %v1889_v32 = vld [vmem:[#allocation3 + $0xe8] sm:$0xff] }
 0x282   : > { %1472 = vst.msk [vmem:[#allocation3 + $0xf0] sm:$0xff] %vm1441_vm9, %v1406_v31  ;;  %2447 = vmatmul.mubr.msk.f32.gmra.mxu1 %vm1897_vm12, %v1889_v32  ;;  %v1567_v39 = vpop.permute.xlu0 %1566 }
 0x283   : > { %1649 = vst.msk [vmem:[#allocation3 + $0x70] sm:$0xff] %vm1634_vm10, %v1567_v39  ;;  %v2433_v40 = vpop.f32.mrf.mxu1 }
 0x284   : > { %2243 = vst.msk [vmem:[%s3473_s8 + $0x98] sm:$0xff] %vm2223_vm13, %v2433_v40 }
 0x285   : > { %v1408_v41 = vpop.permute.xlu1 %1407  ;;  %v2154_v43 = vpop.f32.mrf.mxu1 }
 0x286   : > { %1473 = vst.msk [vmem:[#allocation3 + $0xf8] sm:$0xff] %vm1441_vm9, %v1408_v41  ;;  %v2409_v42 = vpop.f32.mrf.mxu0  ;;  %v1569_v19 = vpop.permute.xlu0 %1568 }
 0x287   : > { %2227 = vst.msk [vmem:[%s3473_s8 + $0x18] sm:$0xff] %vm2223_vm13, %v2409_v42  ;;  %2242 = vst.msk [vmem:[%s3473_s8 + $0x90] sm:$0xff] %vm2223_vm13, %v2154_v43 }
 0x288   : > { %v2074_v44 = vpop.f32.mrf.mxu0  ;;  %1650 = vst.msk [vmem:[#allocation3 + $0x78] sm:$0xff] %vm1634_vm10, %v1569_v19 }
 0x289   : > { %2226 = vst.msk [vmem:[%s3473_s8 + $0x10] sm:$0xff] %vm2223_vm13, %v2074_v44  ;;  %v1599_v46 = vpop.permute.xlu1 %1598 }
 0x28a   : > { %1665 = vst.msk [vmem:[#allocation3 + $0xf0] sm:$0xff] %vm1634_vm10, %v1599_v46  ;;  %v1760_v13 = vpop.permute.xlu0 %1759 }
 0x28b   : > { %1842 = vst.msk [vmem:[#allocation3 + $0x70] sm:$0xff] %vm1827_vm11, %v1760_v13 }
 0x28d   : > { %v1601_v56 = vpop.permute.xlu1 %1600 }
 0x28e   : > { %1666 = vst.msk [vmem:[#allocation3 + $0xf8] sm:$0xff] %vm1634_vm10, %v1601_v56  ;;  %v1762_v20 = vpop.permute.xlu0 %1761 }
 0x28f   : > { %1843 = vst.msk [vmem:[#allocation3 + $0x78] sm:$0xff] %vm1827_vm11, %v1762_v20 }
 0x291   : > { %v1792_v45 = vpop.permute.xlu1 %1791 }
 0x292   : > { %1858 = vst.msk [vmem:[#allocation3 + $0xf0] sm:$0xff] %vm1827_vm11, %v1792_v45  ;;  %v1874_v11 = vld [vmem:[#allocation3 + $0x70] sm:$0xff] }
 0x293   : > { %2425 = vmatprep.mubr.msk.f32.mxu0 %vm1897_vm12, %v1874_v11 }
 0x295   : > { %v1794_v48 = vpop.permute.xlu1 %1793 }
 0x296   : > { %1859 = vst.msk [vmem:[#allocation3 + $0xf8] sm:$0xff] %vm1827_vm11, %v1794_v48  ;;  %v1875_v28 = vld [vmem:[#allocation3 + $0x78] sm:$0xff] }
 0x297   : > { %2426 = vmatmul.mubr.msk.f32.gmra.mxu0 %vm1897_vm12, %v1875_v28 }
 0x299   : > { %v1890_v57 = vld [vmem:[#allocation3 + $0xf0] sm:$0xff] }
 0x29a   : > { %2449 = vmatprep.mubr.msk.f32.mxu1 %vm1897_vm12, %v1890_v57 }
 0x29d   : > { %v1891_v63 = vld [vmem:[#allocation3 + $0xf8] sm:$0xff] }
 0x29e   : > { %2450 = vmatmul.mubr.msk.f32.gmra.mxu1 %vm1897_vm12, %v1891_v63 }
 0x2a7   : > { %v2436_v12 = vpop.f32.mrf.mxu1 }
 0x2a8   : > { %2245 = vst.msk [vmem:[%s3473_s8 + $0xa8] sm:$0xff] %vm2223_vm13, %v2436_v12 }
 0x2a9   : > { %v2164_v6 = vpop.f32.mrf.mxu1 }
 0x2aa   : > { %v2412_v58 = vpop.f32.mrf.mxu0  ;;  %2244 = vst.msk [vmem:[%s3473_s8 + $0xa0] sm:$0xff] %vm2223_vm13, %v2164_v6 }
 0x2ab   : > { %2229 = vst.msk [vmem:[%s3473_s8 + $0x28] sm:$0xff] %vm2223_vm13, %v2412_v58 }
 0x2ac   : > { %v2084_v2 = vpop.f32.mrf.mxu0 }
 0x2ad   : > { %2228 = vst.msk [vmem:[%s3473_s8 + $0x20] sm:$0xff] %vm2223_vm13, %v2084_v2 }
 0x2cb   : > { %v2439_v50 = vpop.f32.mrf.mxu1 }
 0x2cc   : > { %2247 = vst.msk [vmem:[%s3473_s8 + $0xb8] sm:$0xff] %vm2223_vm13, %v2439_v50 }
 0x2cd   : > { %v2174_v1 = vpop.f32.mrf.mxu1 }
 0x2ce   : > { %v2415_v7 = vpop.f32.mrf.mxu0  ;;  %2246 = vst.msk [vmem:[%s3473_s8 + $0xb0] sm:$0xff] %vm2223_vm13, %v2174_v1 }
 0x2cf   : > { %2231 = vst.msk [vmem:[%s3473_s8 + $0x38] sm:$0xff] %vm2223_vm13, %v2415_v7 }
 0x2d0   : > { %v2094_v52 = vpop.f32.mrf.mxu0 }
 0x2d1   : > { %2230 = vst.msk [vmem:[%s3473_s8 + $0x30] sm:$0xff] %vm2223_vm13, %v2094_v52 }
 0x2ef   : > { %v2442_v4 = vpop.f32.mrf.mxu1 }
 0x2f0   : > { %2249 = vst.msk [vmem:[%s3473_s8 + $0xc8] sm:$0xff] %vm2223_vm13, %v2442_v4 }
 0x2f1   : > { %v2184_v10 = vpop.f32.mrf.mxu1 }
 0x2f2   : > { %v2418_v3 = vpop.f32.mrf.mxu0  ;;  %2248 = vst.msk [vmem:[%s3473_s8 + $0xc0] sm:$0xff] %vm2223_vm13, %v2184_v10 }
 0x2f3   : > { %2233 = vst.msk [vmem:[%s3473_s8 + $0x48] sm:$0xff] %vm2223_vm13, %v2418_v3 }
 0x2f4   : > { %v2104_v47 = vpop.f32.mrf.mxu0 }
 0x2f5   : > { %2232 = vst.msk [vmem:[%s3473_s8 + $0x40] sm:$0xff] %vm2223_vm13, %v2104_v47 }
 0x313   : > { %v2421_v5 = vpop.f32.mrf.mxu0 }
 0x314   : > { %2235 = vst.msk [vmem:[%s3473_s8 + $0x58] sm:$0xff] %vm2223_vm13, %v2421_v5 }
 0x315   : > { %v2114_v35 = vpop.f32.mrf.mxu0 }
 0x316   : > { %2234 = vst.msk [vmem:[%s3473_s8 + $0x50] sm:$0xff] %vm2223_vm13, %v2114_v35 }
 0x31a   : > { %v2445_v38 = vpop.f32.mrf.mxu1 }
 0x31b   : > { %2251 = vst.msk [vmem:[%s3473_s8 + $0xd8] sm:$0xff] %vm2223_vm13, %v2445_v38 }
 0x31c   : > { %v2194_v49 = vpop.f32.mrf.mxu1 }
 0x31d   : > { %2250 = vst.msk [vmem:[%s3473_s8 + $0xd0] sm:$0xff] %vm2223_vm13, %v2194_v49 }
 0x33b   : > { %v2424_v37 = vpop.f32.mrf.mxu0 }
 0x33c   : > { %2237 = vst.msk [vmem:[%s3473_s8 + $0x68] sm:$0xff] %vm2223_vm13, %v2424_v37 }
 0x33d   : > { %v2124_v17 = vpop.f32.mrf.mxu0 }
 0x33e   : > { %2236 = vst.msk [vmem:[%s3473_s8 + $0x60] sm:$0xff] %vm2223_vm13, %v2124_v17 }
 0x342   : > { %v2448_v36 = vpop.f32.mrf.mxu1 }
 0x343   : > { %2253 = vst.msk [vmem:[%s3473_s8 + $0xe8] sm:$0xff] %vm2223_vm13, %v2448_v36 }
 0x344   : > { %v2204_v22 = vpop.f32.mrf.mxu1 }
 0x345   : > { %2252 = vst.msk [vmem:[%s3473_s8 + $0xe0] sm:$0xff] %vm2223_vm13, %v2204_v22 }
 0x357   : > { %v2427_v21 = vpop.f32.mrf.mxu0 }
 0x358   : > { %2239 = vst.msk [vmem:[%s3473_s8 + $0x78] sm:$0xff] %vm2223_vm13, %v2427_v21 }
 0x359   : > { %v2134_v51 = vpop.f32.mrf.mxu0 }
 0x35a   : > { %2238 = vst.msk [vmem:[%s3473_s8 + $0x70] sm:$0xff] %vm2223_vm13, %v2134_v51 }
 0x35e   : > { %v2451_v15 = vpop.f32.mrf.mxu1 }
 0x35f   : > { %2255 = vst.msk [vmem:[%s3473_s8 + $0xf8] sm:$0xff] %vm2223_vm13, %v2451_v15 }
 0x360   : > { %v2214_v53 = vpop.f32.mrf.mxu1 }
 0x361   : > { %2254 = vst.msk [vmem:[%s3473_s8 + $0xf0] sm:$0xff] %vm2223_vm13, %v2214_v53 }
 0x362 PF: > { %s12_s9 = sadd.s32 1, %s2485_s9  }
 0x363   : > { %p9_p4 = scmp.ge.s32.totalorder %s12_s9, 4  }
 0x365   :  { %11 = sbr.rel (!%p9_p4) target bundleno = 1 (0x1), region = 61 }

</bundles_post_ra>
